<compile_context>
chip_gen: v6e
topology: v6e:2x2x1
jax: 0.10.0
libtpu: 0.0.40
codegen_flags: <defaults>
</compile_context>

<pallas_src>
import functools
import math

import jax
import jax.numpy as jnp
from jax import lax
from jax.experimental import pallas as pl
from jax.experimental.pallas import tpu as pltpu


def _vmem_limit_bytes():
    # ~75% of physical VMEM: 96 MiB on v5e/v6e (128 MiB), 48 MiB on v7x (64 MiB).
    try:
        cap = pltpu.get_tpu_info().vmem_capacity_bytes
        return max(32 * 1024 * 1024, min(int(cap) * 3 // 4, 112 * 1024 * 1024))
    except Exception:
        return 48 * 1024 * 1024


def _encoder_layer_kernel(num_heads, block_q,
                          x_ref, mask_ref,
                          wq_ref, bq_ref, wkv_ref, bkv_ref,
                          wo_ref, bo_ref, w1_ref, b1_ref, w2_ref, b2_ref,
                          g1_ref, g2_ref,
                          o_ref,
                          k_sc, v_sc):
    eps = 1e-5
    H = num_heads
    tq = block_q
    S, D = x_ref.shape
    dk = D // H
    qt = pl.program_id(1)

    def scalenorm(t, g):
        ss = jnp.sum(t * t, axis=-1, keepdims=True)
        return t * (g * lax.rsqrt(jnp.maximum(ss, eps * eps)))

    g1 = g1_ref[0, 0]

    # ---- once per batch (q-tile 0): K/V over the full sequence, head-packed,
    #      kept resident in bf16 VMEM scratch for every Q tile of this batch ----
    @pl.when(qt == 0)
    def _build_kv():
        x_full = x_ref[...].astype(jnp.float32)                              # [S, D]
        y_full = scalenorm(x_full, g1)
        kv = jnp.dot(y_full.astype(jnp.bfloat16), wkv_ref[...],
                     preferred_element_type=jnp.float32) + bkv_ref[0]        # [S, 2D]
        k = kv[:, :D]
        v = kv[:, D:]
        k_sc[...] = jnp.transpose(k.reshape(S, H, dk), (1, 0, 2)).astype(jnp.bfloat16)
        v_sc[...] = jnp.transpose(v.reshape(S, H, dk), (1, 0, 2)).astype(jnp.bfloat16)

    # ---- per query tile: sublayer 0 = x + MHA(ScaleNorm(x)) (dropout = identity) ----
    row0 = pl.multiple_of(qt * tq, tq)
    x_q = x_ref[pl.ds(row0, tq), :].astype(jnp.float32)                      # [tq, D]
    y_q = scalenorm(x_q, g1)

    # 1/sqrt(dk) is pre-folded into wq / bq in prepare_encoder_params().
    q = jnp.dot(y_q.astype(jnp.bfloat16), wq_ref[...],
                preferred_element_type=jnp.float32) + bq_ref[0]              # [tq, D]
    qh = jnp.transpose(q.reshape(tq, H, dk), (1, 0, 2)).astype(jnp.bfloat16)  # [H, tq, dk]

    scores = jnp.einsum("hqd,hkd->hqk", qh, k_sc[...],
                        preferred_element_type=jnp.float32)                  # [H, tq, S]
    bias = jnp.where(mask_ref[...] > 0, 0.0, -1e9)                           # [1, S]
    scores = scores + bias

    # Softmax in f32; probabilities cast to bf16 only for the P @ V matmul.
    m = jnp.max(scores, axis=-1, keepdims=True)
    p = jnp.exp(scores - m)
    p = p * pl.reciprocal(jnp.sum(p, axis=-1, keepdims=True), approx=True)
    # TODO(synk): attention-weight dropout omitted (eval mode -> identity).

    ctx = jnp.einsum("hqk,hkd->hqd", p.astype(jnp.bfloat16), v_sc[...],
                     preferred_element_type=jnp.float32)                     # [H, tq, dk]
    attn = jnp.transpose(ctx, (1, 0, 2)).reshape(tq, D)                      # [tq, D]
    attn = jnp.dot(attn.astype(jnp.bfloat16), wo_ref[...],
                   preferred_element_type=jnp.float32) + bo_ref[0]
    x1 = x_q + attn

    # ---- per query tile: sublayer 1 = x1 + FF(ScaleNorm(x1)) (dropout = identity) ----
    y2 = scalenorm(x1, g2_ref[0, 0])
    h1 = jnp.dot(y2.astype(jnp.bfloat16), w1_ref[...],
                 preferred_element_type=jnp.float32) + b1_ref[0]             # [tq, F]
    h1 = jnp.maximum(h1, 0.0)
    ff = jnp.dot(h1.astype(jnp.bfloat16), w2_ref[...],
                 preferred_element_type=jnp.float32) + b2_ref[0]             # [tq, D]

    o_ref[...] = (x1 + ff).astype(o_ref.dtype)


def prepare_encoder_params(params, num_heads, compute_dtype=jnp.bfloat16):
    """One-time parameter preprocessing (hoisted out of the call path).

    Concats K/V weights, casts matmul operands to bf16 (MXU-native), and folds
    1/sqrt(dk) into the Q weight and bias. Biases / gains stay f32.
    """
    D = params["wq"].shape[0]
    assert D % num_heads == 0, "embed_dim must be divisible by num_heads"
    scale = 1.0 / math.sqrt(D // num_heads)
    return {
        "wq": (params["wq"] * scale).astype(compute_dtype),
        "bq": (params["bq"] * scale).astype(jnp.float32),
        "wkv": jnp.concatenate([params["wk"], params["wv"]], axis=1).astype(compute_dtype),
        "bkv": jnp.concatenate([params["bk"], params["bv"]], axis=1).astype(jnp.float32),
        "wo": params["wo"].astype(compute_dtype),
        "bo": params["bo"].astype(jnp.float32),
        "w1": params["w1"].astype(compute_dtype),
        "b1": params["b1"].astype(jnp.float32),
        "w2": params["w2"].astype(compute_dtype),
        "b2": params["b2"].astype(jnp.float32),
        "g1": params["g1"].astype(jnp.float32),
        "g2": params["g2"].astype(jnp.float32),
    }


def encoder_layer(x, src_mask, prep, num_heads, *, block_q=256):
    B, S, D = x.shape
    F = prep["w1"].shape[1]
    assert D % num_heads == 0
    dk = D // num_heads
    tq = min(block_q, S)
    assert S % tq == 0, "seq_len must be divisible by the query tile size"
    n_q = S // tq

    def full(shape):
        zeros = (0,) * len(shape)
        # TODO(synk): pipeline_mode=pl.Buffered(1) here once single-buffering of
        # grid-invariant operands is verified on the deployed jax/Mosaic version.
        return pl.BlockSpec(shape, lambda b, qt, _z=zeros: _z)

    in_specs = [
        pl.BlockSpec((pl.Squeezed(), S, D), lambda b, qt: (b, 0, 0)),   # x (full seq per batch)
        pl.BlockSpec((pl.Squeezed(), 1, S), lambda b, qt: (b, 0, 0)),   # mask -> [1, S]
        full((D, D)), full((1, D)),            # wq (scale-folded), bq
        full((D, 2 * D)), full((1, 2 * D)),    # wkv, bkv
        full((D, D)), full((1, D)),            # wo, bo
        full((D, F)), full((1, F)),            # w1, b1
        full((F, D)), full((1, D)),            # w2, b2
        full((1, 1)), full((1, 1)),            # g1, g2 (ScaleNorm gains)
    ]

    return pl.pallas_call(
        functools.partial(_encoder_layer_kernel, num_heads, tq),
        out_shape=jax.ShapeDtypeStruct((B, S, D), x.dtype),
        grid=(B, n_q),
        in_specs=in_specs,
        out_specs=pl.BlockSpec((pl.Squeezed(), tq, D), lambda b, qt: (b, qt, 0)),
        scratch_shapes=[
            pltpu.VMEM((num_heads, S, dk), jnp.bfloat16),   # K, head-packed, resident
            pltpu.VMEM((num_heads, S, dk), jnp.bfloat16),   # V, head-packed, resident
        ],
        compiler_params=pltpu.CompilerParams(
            # Batch axis megacore-sharded; q-tile axis must be "arbitrary" because
            # the resident K/V scratch is built at q-tile 0 and reused across tiles.
            dimension_semantics=("parallel", "arbitrary"),
            vmem_limit_bytes=_vmem_limit_bytes(),
        ),
    )(x, src_mask, prep["wq"], prep["bq"], prep["wkv"], prep["bkv"],
      prep["wo"], prep["bo"], prep["w1"], prep["b1"], prep["w2"], prep["b2"],
      prep["g1"], prep["g2"])


def reference(x, src_mask, p, num_heads):
    """Pure-JAX f32 reference of the same forward pass (for a sanity check)."""
    def scalenorm(t, g):
        n = jnp.sqrt(jnp.sum(t * t, axis=-1, keepdims=True))
        return t * (g / jnp.maximum(n, 1e-5))

    B, S, D = x.shape
    dk = D // num_heads
    y = scalenorm(x, p["g1"][0, 0])
    q = y @ p["wq"] + p["bq"][0]
    k = y @ p["wk"] + p["bk"][0]
    v = y @ p["wv"] + p["bv"][0]
    q = q.reshape(B, S, num_heads, dk).transpose(0, 2, 1, 3)
    k = k.reshape(B, S, num_heads, dk).transpose(0, 2, 1, 3)
    v = v.reshape(B, S, num_heads, dk).transpose(0, 2, 1, 3)
    scores = jnp.einsum("bhqd,bhkd->bhqk", q, k) / math.sqrt(dk)
    scores = jnp.where(src_mask[:, None, :, :] > 0, scores, -1e9)
    attn = jax.nn.softmax(scores, axis=-1)
    o = jnp.einsum("bhqk,bhkd->bhqd", attn, v).transpose(0, 2, 1, 3).reshape(B, S, D)
    o = o @ p["wo"] + p["bo"][0]
    x1 = x + o
    y2 = scalenorm(x1, p["g2"][0, 0])
    ff = jnp.maximum(y2 @ p["w1"] + p["b1"][0], 0.0) @ p["w2"] + p["b2"][0]
    return x1 + ff


if __name__ == "__main__":
    B, S, D, F, H = 2, 16, 32, 64, 4

    key = jax.random.PRNGKey(0)
    keys = jax.random.split(key, 16)

    def init_w(k, shape):
        return (0.05 * jax.random.normal(k, shape)).astype(jnp.float32)

    params = {
        "wq": init_w(keys[0], (D, D)), "bq": init_w(keys[1], (1, D)),
        "wk": init_w(keys[2], (D, D)), "bk": init_w(keys[3], (1, D)),
        "wv": init_w(keys[4], (D, D)), "bv": init_w(keys[5], (1, D)),
        "wo": init_w(keys[6], (D, D)), "bo": init_w(keys[7], (1, D)),
        "w1": init_w(keys[8], (D, F)), "b1": init_w(keys[9], (1, F)),
        "w2": init_w(keys[10], (F, D)), "b2": init_w(keys[11], (1, D)),
        "g1": jnp.full((1, 1), math.sqrt(D), jnp.float32),   # ScaleNorm(embed_dim**0.5)
        "g2": jnp.full((1, 1), math.sqrt(D), jnp.float32),
    }

    x = jax.random.normal(keys[12], (B, S, D), dtype=jnp.float32)
    # src_mask: batch 0 has 10 valid key positions, batch 1 has all 16.
    mask = jnp.ones((B, 1, S), jnp.float32)
    mask = mask.at[0, 0, 10:].set(0.0)

    # One-time weight preprocessing (hoisted out of the call path).
    prep = prepare_encoder_params(params, num_heads=H)

    # block_q=8 -> 2 query tiles per batch: exercises both the q-tile-0 K/V build
    # and the K/V-reuse path of later tiles. (Production: block_q ~ 256.)
    out = encoder_layer(x, mask, prep, num_heads=H, block_q=8)
    out = jax.block_until_ready(out)

    ref = reference(x, mask, params, H)
    assert out.shape == (B, S, D)
    # bf16 MXU operands vs. f32 reference -> looser (but still tight) tolerance.
    assert jnp.allclose(out, ref, rtol=2e-2, atol=2e-2), "mismatch vs JAX reference"

    print("KERNEL_OK")
</pallas_src>

<mosaic_0001>
module attributes {stable_mosaic.version = 11 : i64} {
  func.func @_encoder_layer_kernel(%arg0: i32, %arg1: i32, %arg2: memref<1x16x32xf32, #tpu.memory_space<vmem>>, %arg3: memref<1x1x16xf32, #tpu.memory_space<vmem>>, %arg4: memref<32x32xbf16, #tpu.memory_space<vmem>>, %arg5: memref<1x32xf32, #tpu.memory_space<vmem>>, %arg6: memref<32x64xbf16, #tpu.memory_space<vmem>>, %arg7: memref<1x64xf32, #tpu.memory_space<vmem>>, %arg8: memref<32x32xbf16, #tpu.memory_space<vmem>>, %arg9: memref<1x32xf32, #tpu.memory_space<vmem>>, %arg10: memref<32x64xbf16, #tpu.memory_space<vmem>>, %arg11: memref<1x64xf32, #tpu.memory_space<vmem>>, %arg12: memref<64x32xbf16, #tpu.memory_space<vmem>>, %arg13: memref<1x32xf32, #tpu.memory_space<vmem>>, %arg14: memref<1x1xf32, #tpu.memory_space<vmem>>, %arg15: memref<1x1xf32, #tpu.memory_space<vmem>>, %arg16: memref<1x8x32xf32, #tpu.memory_space<vmem>>, %arg17: memref<4x16x8xbf16, #tpu.memory_space<vmem>>, %arg18: memref<4x16x8xbf16, #tpu.memory_space<vmem>>) attributes {dimension_semantics = [#tpu.dimension_semantics<parallel>, #tpu.dimension_semantics<arbitrary>], iteration_bounds = array<i64: 2, 2>, scalar_prefetch = 0 : i64, scratch_operands = 2 : i64, tpu.core_type = #tpu.core_type<tc>, window_params = [{transform_indices = @transform_0, window_bounds = array<i64: 1, 16, 32>}, {transform_indices = @transform_1, window_bounds = array<i64: 1, 1, 16>}, {pipeline_mode = #tpu.pipeline_mode<synchronous>, transform_indices = @transform_2, window_bounds = array<i64: 32, 32>}, {pipeline_mode = #tpu.pipeline_mode<synchronous>, transform_indices = @transform_3, window_bounds = array<i64: 1, 32>}, {pipeline_mode = #tpu.pipeline_mode<synchronous>, transform_indices = @transform_4, window_bounds = array<i64: 32, 64>}, {pipeline_mode = #tpu.pipeline_mode<synchronous>, transform_indices = @transform_5, window_bounds = array<i64: 1, 64>}, {pipeline_mode = #tpu.pipeline_mode<synchronous>, transform_indices = @transform_6, window_bounds = array<i64: 32, 32>}, {pipeline_mode = #tpu.pipeline_mode<synchronous>, transform_indices = @transform_7, window_bounds = array<i64: 1, 32>}, {pipeline_mode = #tpu.pipeline_mode<synchronous>, transform_indices = @transform_8, window_bounds = array<i64: 32, 64>}, {pipeline_mode = #tpu.pipeline_mode<synchronous>, transform_indices = @transform_9, window_bounds = array<i64: 1, 64>}, {pipeline_mode = #tpu.pipeline_mode<synchronous>, transform_indices = @transform_10, window_bounds = array<i64: 64, 32>}, {pipeline_mode = #tpu.pipeline_mode<synchronous>, transform_indices = @transform_11, window_bounds = array<i64: 1, 32>}, {pipeline_mode = #tpu.pipeline_mode<synchronous>, transform_indices = @transform_12, window_bounds = array<i64: 1, 1>}, {pipeline_mode = #tpu.pipeline_mode<synchronous>, transform_indices = @transform_13, window_bounds = array<i64: 1, 1>}, {transform_indices = @transform_14, window_bounds = array<i64: 1, 8, 32>}]} {
    %c0 = arith.constant 0 : index
    %c0_0 = arith.constant 0 : index
    %0 = vector.load %arg14[%c0, %c0_0] : memref<1x1xf32, #tpu.memory_space<vmem>>, vector<1x1xf32>
    %1 = vector.extract %0[0, 0] : f32 from vector<1x1xf32>
    %c0_i32 = arith.constant 0 : i32
    %2 = arith.cmpi eq, %arg1, %c0_i32 : i32
    %3 = arith.extui %2 : i1 to i32
    %c0_i32_1 = arith.constant 0 : i32
    %4 = arith.cmpi ne, %3, %c0_i32_1 : i32
    scf.if %4 {
      %c0_49 = arith.constant 0 : index
      %c0_50 = arith.constant 0 : index
      %c0_51 = arith.constant 0 : index
      %101 = vector.load %arg2[%c0_49, %c0_50, %c0_51] : memref<1x16x32xf32, #tpu.memory_space<vmem>>, vector<1x16x32xf32>
      %102 = vector.shape_cast %101 : vector<1x16x32xf32> to vector<16x32xf32>
      %103 = arith.mulf %102, %102 : vector<16x32xf32>
      %cst_52 = arith.constant dense<0.000000e+00> : vector<16xf32>
      %104 = vector.multi_reduction <add>, %103, %cst_52 [1] : vector<16x32xf32> to vector<16xf32>
      %105 = vector.shape_cast %104 : vector<16xf32> to vector<16x1xf32>
      %cst_53 = arith.constant 1.000000e-10 : f32
      %106 = vector.broadcast %cst_53 : f32 to vector<16x1xf32>
      %107 = arith.maximumf %105, %106 : vector<16x1xf32>
      %108 = math.rsqrt %107 : vector<16x1xf32>
      %109 = vector.broadcast %1 : f32 to vector<16x1xf32>
      %110 = arith.mulf %109, %108 : vector<16x1xf32>
      %111 = vector.broadcast %110 : vector<16x1xf32> to vector<16x32xf32>
      %112 = arith.mulf %102, %111 : vector<16x32xf32>
      %113 = arith.truncf %112 : vector<16x32xf32> to vector<16x32xbf16>
      %c0_54 = arith.constant 0 : index
      %c0_55 = arith.constant 0 : index
      %114 = vector.load %arg6[%c0_54, %c0_55] : memref<32x64xbf16, #tpu.memory_space<vmem>>, vector<32x64xbf16>
      %cst_56 = arith.constant dense<0.000000e+00> : vector<16x64xf32>
      %115 = tpu.matmul %113, %114, %cst_56 {dimension_numbers = #tpu.dot_dimension_numbers<[1], [0], [0], [1], [0, 0, 1, 1], [], []>} : vector<16x32xbf16>, vector<32x64xbf16>, vector<16x64xf32> -> vector<16x64xf32>
      %c0_57 = arith.constant 0 : index
      %c0_58 = arith.constant 0 : index
      %116 = vector.load %arg7[%c0_57, %c0_58] : memref<1x64xf32, #tpu.memory_space<vmem>>, vector<1x64xf32>
      %117 = vector.shape_cast %116 : vector<1x64xf32> to vector<64xf32>
      %118 = vector.shape_cast %117 : vector<64xf32> to vector<1x64xf32>
      %119 = vector.broadcast %118 : vector<1x64xf32> to vector<16x64xf32>
      %120 = arith.addf %115, %119 : vector<16x64xf32>
      %121 = vector.extract_strided_slice %120 {offsets = [0, 0], sizes = [16, 32], strides = [1, 1]} : vector<16x64xf32> to vector<16x32xf32>
      %122 = vector.extract_strided_slice %120 {offsets = [0, 32], sizes = [16, 32], strides = [1, 1]} : vector<16x64xf32> to vector<16x32xf32>
      %123 = vector.shape_cast %121 : vector<16x32xf32> to vector<16x4x8xf32>
      %124 = tpu.transpose %123, [1, 0, 2] : vector<16x4x8xf32> -> vector<4x16x8xf32>
      %125 = arith.truncf %124 : vector<4x16x8xf32> to vector<4x16x8xbf16>
      %c0_59 = arith.constant 0 : index
      %c0_60 = arith.constant 0 : index
      %c0_61 = arith.constant 0 : index
      %126 = vector.load %arg17[%c0_59, %c0_60, %c0_61] : memref<4x16x8xbf16, #tpu.memory_space<vmem>>, vector<4x16x8xbf16>
      tpu.vector_store %arg17[%c0_59, %c0_60, %c0_61], %125 {strides = array<i32>} : memref<4x16x8xbf16, #tpu.memory_space<vmem>>, vector<4x16x8xbf16>,
      %127 = vector.shape_cast %122 : vector<16x32xf32> to vector<16x4x8xf32>
      %128 = tpu.transpose %127, [1, 0, 2] : vector<16x4x8xf32> -> vector<4x16x8xf32>
      %129 = arith.truncf %128 : vector<4x16x8xf32> to vector<4x16x8xbf16>
      %c0_62 = arith.constant 0 : index
      %c0_63 = arith.constant 0 : index
      %c0_64 = arith.constant 0 : index
      %130 = vector.load %arg18[%c0_62, %c0_63, %c0_64] : memref<4x16x8xbf16, #tpu.memory_space<vmem>>, vector<4x16x8xbf16>
      tpu.vector_store %arg18[%c0_62, %c0_63, %c0_64], %129 {strides = array<i32>} : memref<4x16x8xbf16, #tpu.memory_space<vmem>>, vector<4x16x8xbf16>,
    } else {
    }
    %c8_i32 = arith.constant 8 : i32
    %5 = arith.muli %arg1, %c8_i32 : i32
    %6 = tpu.assume_multiple %5, 8 : i32
    %c0_2 = arith.constant 0 : index
    %7 = arith.index_cast %6 : i32 to index
    %c0_3 = arith.constant 0 : index
    %8 = vector.load %arg2[%c0_2, %7, %c0_3] : memref<1x16x32xf32, #tpu.memory_space<vmem>>, vector<1x8x32xf32>
    %9 = vector.shape_cast %8 : vector<1x8x32xf32> to vector<8x32xf32>
    %10 = arith.mulf %9, %9 : vector<8x32xf32>
    %cst = arith.constant dense<0.000000e+00> : vector<8xf32>
    %11 = vector.multi_reduction <add>, %10, %cst [1] : vector<8x32xf32> to vector<8xf32>
    %12 = vector.shape_cast %11 : vector<8xf32> to vector<8x1xf32>
    %cst_4 = arith.constant 1.000000e-10 : f32
    %13 = vector.broadcast %cst_4 : f32 to vector<8x1xf32>
    %14 = arith.maximumf %12, %13 : vector<8x1xf32>
    %15 = math.rsqrt %14 : vector<8x1xf32>
    %16 = vector.broadcast %1 : f32 to vector<8x1xf32>
    %17 = arith.mulf %16, %15 : vector<8x1xf32>
    %18 = vector.broadcast %17 : vector<8x1xf32> to vector<8x32xf32>
    %19 = arith.mulf %9, %18 : vector<8x32xf32>
    %20 = arith.truncf %19 : vector<8x32xf32> to vector<8x32xbf16>
    %c0_5 = arith.constant 0 : index
    %c0_6 = arith.constant 0 : index
    %21 = vector.load %arg4[%c0_5, %c0_6] : memref<32x32xbf16, #tpu.memory_space<vmem>>, vector<32x32xbf16>
    %cst_7 = arith.constant dense<0.000000e+00> : vector<8x32xf32>
    %22 = tpu.matmul %20, %21, %cst_7 {dimension_numbers = #tpu.dot_dimension_numbers<[1], [0], [0], [1], [0, 0, 1, 1], [], []>} : vector<8x32xbf16>, vector<32x32xbf16>, vector<8x32xf32> -> vector<8x32xf32>
    %c0_8 = arith.constant 0 : index
    %c0_9 = arith.constant 0 : index
    %23 = vector.load %arg5[%c0_8, %c0_9] : memref<1x32xf32, #tpu.memory_space<vmem>>, vector<1x32xf32>
    %24 = vector.shape_cast %23 : vector<1x32xf32> to vector<32xf32>
    %25 = vector.shape_cast %24 : vector<32xf32> to vector<1x32xf32>
    %26 = vector.broadcast %25 : vector<1x32xf32> to vector<8x32xf32>
    %27 = arith.addf %22, %26 : vector<8x32xf32>
    %28 = vector.shape_cast %27 : vector<8x32xf32> to vector<8x4x8xf32>
    %29 = tpu.transpose %28, [1, 0, 2] : vector<8x4x8xf32> -> vector<4x8x8xf32>
    %30 = arith.truncf %29 : vector<4x8x8xf32> to vector<4x8x8xbf16>
    %c0_10 = arith.constant 0 : index
    %c0_11 = arith.constant 0 : index
    %c0_12 = arith.constant 0 : index
    %31 = vector.load %arg17[%c0_10, %c0_11, %c0_12] : memref<4x16x8xbf16, #tpu.memory_space<vmem>>, vector<4x16x8xbf16>
    "tpu.trace_start"() <{level = 10 : i32, message = "hqd,hkd->hqk"}> : () -> ()
    %cst_13 = arith.constant dense<0.000000e+00> : vector<4x8x16xf32>
    %32 = tpu.matmul %30, %31, %cst_13 {dimension_numbers = #tpu.dot_dimension_numbers<[2], [2], [1], [1], [0, 0, 0, 1, 1, 1], [0], [0]>} : vector<4x8x8xbf16>, vector<4x16x8xbf16>, vector<4x8x16xf32> -> vector<4x8x16xf32>
    "tpu.trace_stop"() : () -> ()
    %c0_14 = arith.constant 0 : index
    %c0_15 = arith.constant 0 : index
    %c0_16 = arith.constant 0 : index
    %33 = vector.load %arg3[%c0_14, %c0_15, %c0_16] : memref<1x1x16xf32, #tpu.memory_space<vmem>>, vector<1x1x16xf32>
    %34 = vector.shape_cast %33 : vector<1x1x16xf32> to vector<1x16xf32>
    %cst_17 = arith.constant 0.000000e+00 : f32
    %35 = vector.broadcast %cst_17 : f32 to vector<1x16xf32>
    %36 = arith.cmpf ogt, %34, %35 : vector<1x16xf32>
    %cst_18 = arith.constant 0.000000e+00 : f32
    %cst_19 = arith.constant -1.000000e+09 : f32
    %37 = vector.broadcast %cst_18 : f32 to vector<1x16xf32>
    %38 = vector.broadcast %cst_19 : f32 to vector<1x16xf32>
    %39 = arith.select %36, %37, %38 : vector<1x16xi1>, vector<1x16xf32>
    %40 = vector.shape_cast %39 : vector<1x16xf32> to vector<1x1x16xf32>
    %41 = vector.broadcast %40 : vector<1x1x16xf32> to vector<4x8x16xf32>
    %42 = arith.addf %32, %41 : vector<4x8x16xf32>
    %cst_20 = arith.constant dense<0xFF800000> : vector<4x8xf32>
    %43 = vector.multi_reduction <maximumf>, %42, %cst_20 [2] : vector<4x8x16xf32> to vector<4x8xf32>
    %44 = vector.shape_cast %43 : vector<4x8xf32> to vector<4x8x1xf32>
    %45 = vector.broadcast %44 : vector<4x8x1xf32> to vector<4x8x16xf32>
    %46 = arith.subf %42, %45 : vector<4x8x16xf32>
    %47 = math.exp %46 : vector<4x8x16xf32>
    %cst_21 = arith.constant dense<0.000000e+00> : vector<4x8xf32>
    %48 = vector.multi_reduction <add>, %47, %cst_21 [2] : vector<4x8x16xf32> to vector<4x8xf32>
    %49 = vector.shape_cast %48 : vector<4x8xf32> to vector<4x8x1xf32>
    %50 = tpu.reciprocal %49 {approx = true} : vector<4x8x1xf32> -> vector<4x8x1xf32>
    %51 = vector.broadcast %50 : vector<4x8x1xf32> to vector<4x8x16xf32>
    %52 = arith.mulf %47, %51 : vector<4x8x16xf32>
    %53 = arith.truncf %52 : vector<4x8x16xf32> to vector<4x8x16xbf16>
    %c0_22 = arith.constant 0 : index
    %c0_23 = arith.constant 0 : index
    %c0_24 = arith.constant 0 : index
    %54 = vector.load %arg18[%c0_22, %c0_23, %c0_24] : memref<4x16x8xbf16, #tpu.memory_space<vmem>>, vector<4x16x8xbf16>
    "tpu.trace_start"() <{level = 10 : i32, message = "hqk,hkd->hqd"}> : () -> ()
    %cst_25 = arith.constant dense<0.000000e+00> : vector<4x8x8xf32>
    %55 = tpu.matmul %53, %54, %cst_25 {dimension_numbers = #tpu.dot_dimension_numbers<[2], [1], [1], [2], [0, 0, 0, 1, 1, 2], [0], [0]>} : vector<4x8x16xbf16>, vector<4x16x8xbf16>, vector<4x8x8xf32> -> vector<4x8x8xf32>
    "tpu.trace_stop"() : () -> ()
    %56 = tpu.transpose %55, [1, 0, 2] : vector<4x8x8xf32> -> vector<8x4x8xf32>
    %57 = vector.shape_cast %56 : vector<8x4x8xf32> to vector<8x32xf32>
    %58 = arith.truncf %57 : vector<8x32xf32> to vector<8x32xbf16>
    %c0_26 = arith.constant 0 : index
    %c0_27 = arith.constant 0 : index
    %59 = vector.load %arg8[%c0_26, %c0_27] : memref<32x32xbf16, #tpu.memory_space<vmem>>, vector<32x32xbf16>
    %cst_28 = arith.constant dense<0.000000e+00> : vector<8x32xf32>
    %60 = tpu.matmul %58, %59, %cst_28 {dimension_numbers = #tpu.dot_dimension_numbers<[1], [0], [0], [1], [0, 0, 1, 1], [], []>} : vector<8x32xbf16>, vector<32x32xbf16>, vector<8x32xf32> -> vector<8x32xf32>
    %c0_29 = arith.constant 0 : index
    %c0_30 = arith.constant 0 : index
    %61 = vector.load %arg9[%c0_29, %c0_30] : memref<1x32xf32, #tpu.memory_space<vmem>>, vector<1x32xf32>
    %62 = vector.shape_cast %61 : vector<1x32xf32> to vector<32xf32>
    %63 = vector.shape_cast %62 : vector<32xf32> to vector<1x32xf32>
    %64 = vector.broadcast %63 : vector<1x32xf32> to vector<8x32xf32>
    %65 = arith.addf %60, %64 : vector<8x32xf32>
    %66 = arith.addf %9, %65 : vector<8x32xf32>
    %c0_31 = arith.constant 0 : index
    %c0_32 = arith.constant 0 : index
    %67 = vector.load %arg15[%c0_31, %c0_32] : memref<1x1xf32, #tpu.memory_space<vmem>>, vector<1x1xf32>
    %68 = vector.extract %67[0, 0] : f32 from vector<1x1xf32>
    %69 = arith.mulf %66, %66 : vector<8x32xf32>
    %cst_33 = arith.constant dense<0.000000e+00> : vector<8xf32>
    %70 = vector.multi_reduction <add>, %69, %cst_33 [1] : vector<8x32xf32> to vector<8xf32>
    %71 = vector.shape_cast %70 : vector<8xf32> to vector<8x1xf32>
    %cst_34 = arith.constant 1.000000e-10 : f32
    %72 = vector.broadcast %cst_34 : f32 to vector<8x1xf32>
    %73 = arith.maximumf %71, %72 : vector<8x1xf32>
    %74 = math.rsqrt %73 : vector<8x1xf32>
    %75 = vector.broadcast %68 : f32 to vector<8x1xf32>
    %76 = arith.mulf %75, %74 : vector<8x1xf32>
    %77 = vector.broadcast %76 : vector<8x1xf32> to vector<8x32xf32>
    %78 = arith.mulf %66, %77 : vector<8x32xf32>
    %79 = arith.truncf %78 : vector<8x32xf32> to vector<8x32xbf16>
    %c0_35 = arith.constant 0 : index
    %c0_36 = arith.constant 0 : index
    %80 = vector.load %arg10[%c0_35, %c0_36] : memref<32x64xbf16, #tpu.memory_space<vmem>>, vector<32x64xbf16>
    %cst_37 = arith.constant dense<0.000000e+00> : vector<8x64xf32>
    %81 = tpu.matmul %79, %80, %cst_37 {dimension_numbers = #tpu.dot_dimension_numbers<[1], [0], [0], [1], [0, 0, 1, 1], [], []>} : vector<8x32xbf16>, vector<32x64xbf16>, vector<8x64xf32> -> vector<8x64xf32>
    %c0_38 = arith.constant 0 : index
    %c0_39 = arith.constant 0 : index
    %82 = vector.load %arg11[%c0_38, %c0_39] : memref<1x64xf32, #tpu.memory_space<vmem>>, vector<1x64xf32>
    %83 = vector.shape_cast %82 : vector<1x64xf32> to vector<64xf32>
    %84 = vector.shape_cast %83 : vector<64xf32> to vector<1x64xf32>
    %85 = vector.broadcast %84 : vector<1x64xf32> to vector<8x64xf32>
    %86 = arith.addf %81, %85 : vector<8x64xf32>
    %cst_40 = arith.constant 0.000000e+00 : f32
    %87 = vector.broadcast %cst_40 : f32 to vector<8x64xf32>
    %88 = arith.maximumf %86, %87 : vector<8x64xf32>
    %89 = arith.truncf %88 : vector<8x64xf32> to vector<8x64xbf16>
    %c0_41 = arith.constant 0 : index
    %c0_42 = arith.constant 0 : index
    %90 = vector.load %arg12[%c0_41, %c0_42] : memref<64x32xbf16, #tpu.memory_space<vmem>>, vector<64x32xbf16>
    %cst_43 = arith.constant dense<0.000000e+00> : vector<8x32xf32>
    %91 = tpu.matmul %89, %90, %cst_43 {dimension_numbers = #tpu.dot_dimension_numbers<[1], [0], [0], [1], [0, 0, 1, 1], [], []>} : vector<8x64xbf16>, vector<64x32xbf16>, vector<8x32xf32> -> vector<8x32xf32>
    %c0_44 = arith.constant 0 : index
    %c0_45 = arith.constant 0 : index
    %92 = vector.load %arg13[%c0_44, %c0_45] : memref<1x32xf32, #tpu.memory_space<vmem>>, vector<1x32xf32>
    %93 = vector.shape_cast %92 : vector<1x32xf32> to vector<32xf32>
    %94 = vector.shape_cast %93 : vector<32xf32> to vector<1x32xf32>
    %95 = vector.broadcast %94 : vector<1x32xf32> to vector<8x32xf32>
    %96 = arith.addf %91, %95 : vector<8x32xf32>
    %97 = arith.addf %66, %96 : vector<8x32xf32>
    %c0_46 = arith.constant 0 : index
    %c0_47 = arith.constant 0 : index
    %c0_48 = arith.constant 0 : index
    %98 = vector.load %arg16[%c0_46, %c0_47, %c0_48] : memref<1x8x32xf32, #tpu.memory_space<vmem>>, vector<1x8x32xf32>
    %99 = vector.shape_cast %98 : vector<1x8x32xf32> to vector<8x32xf32>
    %100 = vector.shape_cast %97 : vector<8x32xf32> to vector<1x8x32xf32>
    tpu.vector_store %arg16[%c0_46, %c0_47, %c0_48], %100 {strides = array<i32>} : memref<1x8x32xf32, #tpu.memory_space<vmem>>, vector<1x8x32xf32>,
    return
  }
  func.func @transform_0(%arg0: i32, %arg1: i32) -> (i32, i32, i32) {
    %c0_i32 = arith.constant 0 : i32
    %c0_i32_0 = arith.constant 0 : i32
    %c0_i32_1 = arith.constant 0 : i32
    return %arg0, %c0_i32, %c0_i32_0 : i32, i32, i32
  }
  func.func @transform_1(%arg0: i32, %arg1: i32) -> (i32, i32, i32) {
    %c0_i32 = arith.constant 0 : i32
    %c0_i32_0 = arith.constant 0 : i32
    %c0_i32_1 = arith.constant 0 : i32
    return %arg0, %c0_i32, %c0_i32_0 : i32, i32, i32
  }
  func.func @transform_2(%arg0: i32, %arg1: i32) -> (i32, i32) {
    %c0_i32 = arith.constant 0 : i32
    %c0_i32_0 = arith.constant 0 : i32
    %c0_i32_1 = arith.constant 0 : i32
    return %c0_i32, %c0_i32_0 : i32, i32
  }
  func.func @transform_3(%arg0: i32, %arg1: i32) -> (i32, i32) {
    %c0_i32 = arith.constant 0 : i32
    %c0_i32_0 = arith.constant 0 : i32
    %c0_i32_1 = arith.constant 0 : i32
    return %c0_i32, %c0_i32_0 : i32, i32
  }
  func.func @transform_4(%arg0: i32, %arg1: i32) -> (i32, i32) {
    %c0_i32 = arith.constant 0 : i32
    %c0_i32_0 = arith.constant 0 : i32
    %c0_i32_1 = arith.constant 0 : i32
    return %c0_i32, %c0_i32_0 : i32, i32
  }
  func.func @transform_5(%arg0: i32, %arg1: i32) -> (i32, i32) {
    %c0_i32 = arith.constant 0 : i32
    %c0_i32_0 = arith.constant 0 : i32
    %c0_i32_1 = arith.constant 0 : i32
    return %c0_i32, %c0_i32_0 : i32, i32
  }
  func.func @transform_6(%arg0: i32, %arg1: i32) -> (i32, i32) {
    %c0_i32 = arith.constant 0 : i32
    %c0_i32_0 = arith.constant 0 : i32
    %c0_i32_1 = arith.constant 0 : i32
    return %c0_i32, %c0_i32_0 : i32, i32
  }
  func.func @transform_7(%arg0: i32, %arg1: i32) -> (i32, i32) {
    %c0_i32 = arith.constant 0 : i32
    %c0_i32_0 = arith.constant 0 : i32
    %c0_i32_1 = arith.constant 0 : i32
    return %c0_i32, %c0_i32_0 : i32, i32
  }
  func.func @transform_8(%arg0: i32, %arg1: i32) -> (i32, i32) {
    %c0_i32 = arith.constant 0 : i32
    %c0_i32_0 = arith.constant 0 : i32
    %c0_i32_1 = arith.constant 0 : i32
    return %c0_i32, %c0_i32_0 : i32, i32
  }
  func.func @transform_9(%arg0: i32, %arg1: i32) -> (i32, i32) {
    %c0_i32 = arith.constant 0 : i32
    %c0_i32_0 = arith.constant 0 : i32
    %c0_i32_1 = arith.constant 0 : i32
    return %c0_i32, %c0_i32_0 : i32, i32
  }
  func.func @transform_10(%arg0: i32, %arg1: i32) -> (i32, i32) {
    %c0_i32 = arith.constant 0 : i32
    %c0_i32_0 = arith.constant 0 : i32
    %c0_i32_1 = arith.constant 0 : i32
    return %c0_i32, %c0_i32_0 : i32, i32
  }
  func.func @transform_11(%arg0: i32, %arg1: i32) -> (i32, i32) {
    %c0_i32 = arith.constant 0 : i32
    %c0_i32_0 = arith.constant 0 : i32
    %c0_i32_1 = arith.constant 0 : i32
    return %c0_i32, %c0_i32_0 : i32, i32
  }
  func.func @transform_12(%arg0: i32, %arg1: i32) -> (i32, i32) {
    %c0_i32 = arith.constant 0 : i32
    %c0_i32_0 = arith.constant 0 : i32
    %c0_i32_1 = arith.constant 0 : i32
    return %c0_i32, %c0_i32_0 : i32, i32
  }
  func.func @transform_13(%arg0: i32, %arg1: i32) -> (i32, i32) {
    %c0_i32 = arith.constant 0 : i32
    %c0_i32_0 = arith.constant 0 : i32
    %c0_i32_1 = arith.constant 0 : i32
    return %c0_i32, %c0_i32_0 : i32, i32
  }
  func.func @transform_14(%arg0: i32, %arg1: i32) -> (i32, i32, i32) {
    %c0_i32 = arith.constant 0 : i32
    %c0_i32_0 = arith.constant 0 : i32
    return %arg0, %arg1, %c0_i32 : i32, i32, i32
  }
}

</mosaic_0001>

<bundles_post_ra>
// kernel: tpu_custom_call.1
= control target key start
LH: loop header
LB: loop body
LE: loop exit
PB: predicated region body
PF: predicated region fallthrough
CT: control target
= control target key end

     0   :  { %s3694_s0 = inlined_call_operand.vmem [shape: f32[2,16,32], index: 0, kind: input, shape index: {}]   ;;  %s3695_s1 = inlined_call_operand.vmem [shape: f32[2,1,16], index: 1, kind: input, shape index: {}]   ;;  %s3696_s2 = inlined_call_operand.vmem [shape: bf16[32,32], index: 2, kind: input, shape index: {}]   ;;  %s3697_s3 = inlined_call_operand.vmem [shape: f32[1,32], index: 3, kind: input, shape index: {}]   ;;  %s3698_s4 = inlined_call_operand.hbm [shape: bf16[32,64], index: 4, kind: input, shape index: {}]   ;;  %s3699_s5 = inlined_call_operand.vmem [shape: f32[1,64], index: 5, kind: input, shape index: {}]   ;;  %s3700_s6 = inlined_call_operand.hbm [shape: bf16[32,32], index: 6, kind: input, shape index: {}]   ;;  %s3701_s7 = inlined_call_operand.vmem [shape: f32[1,32], index: 7, kind: input, shape index: {}]   ;;  %s3702_s8 = inlined_call_operand.hbm [shape: bf16[32,64], index: 8, kind: input, shape index: {}]   ;;  %s3703_s9 = inlined_call_operand.vmem [shape: f32[1,64], index: 9, kind: input, shape index: {}]   ;;  %s3704_s10 = inlined_call_operand.vmem [shape: bf16[64,32], index: 10, kind: input, shape index: {}]   ;;  %s3705_s11 = inlined_call_operand.vmem [shape: f32[1,32], index: 11, kind: input, shape index: {}]   ;;  %s3706_s12 = inlined_call_operand.<no memory space> [shape: f32[1,1], index: 12, kind: input, shape index: {}]   ;;  %s3707_s14 = inlined_call_operand.hbm [shape: f32[2,16,32], index: 14, kind: output, shape index: {}]   ;;  %s3708_s13 = inlined_call_operand.<no memory space> [shape: f32[1,1], index: 13, kind: input, shape index: {}]  }
   0x1   :  { %v19_v0 = vstv %s3706_s12  ;;  %v21_v1 = vstv %s3708_s13 }
   0x2   :  { %20 = vst [vmem:[#allocation4] sm:$0x1] %v19_v0  ;;  %22 = vst [vmem:[#allocation5] sm:$0x1] %v21_v1 }
   0x3   :  { %23 = vsyncpa [#allocation7], 0 }
   0x4   :  { %24 = vsyncpa [#allocation10], 0 }
   0x5   :  { %25 = vsyncpa [#allocation8], 0 }
   0x6   :  { %27 = vsyncpa [#allocation8 + $0x1], 0  ;;  %s3212_s17 = smov 0   ;;  %s3214_s18 = smov 0  }
   0x7   :  { %s3216_s19 = smov 0   ;;  %s3218_s20 = smov 0  }
   0x8   :  { %s3220_s21 = smov 0   ;;  %s3222_s12 = smov 0  }
   0x9   :  { %s3224_s22 = smov 0   ;;  %s3226_s13 = smov 0  }
   0xa LB: > { %3716 = sst [smem:[#allocation16_spill]] %s3076_s17  ;;  %s2526_s23 = sadd.s32 4294967295, %s3104_s13   ;;  %s3104_s13 = sphi %s3226_s13, %s33_s13   ;;  %s3100_s22 = sphi %s3224_s22, %s3737_s22   ;;  %s3096_s12 = sphi %s3222_s12, %s3736_s12   ;;  %s3092_s21 = sphi %s3220_s21, %s3735_s21   ;;  %s3088_s20 = sphi %s3218_s20, %s3734_s20   ;;  %s3084_s19 = sphi %s3216_s19, %s3733_s19   ;;  %s3080_s18 = sphi %s3214_s18, %s3739_s18   ;;  %s3076_s17 = sphi %s3212_s17, %s3738_s17  }
   0xb   : > { %3717 = sst [smem:[#allocation17_spill]] %s3084_s19  ;;  %s2527_s24 = sadd.s32 4294967294, %s3104_s13  }
   0xc   : > { %3718 = sst [smem:[#allocation18_spill]] %s3096_s12  ;;  %s42_s25 = sadd.s32 1, %s3096_s12 }
   0xd   : > { %3719 = sst [smem:[#allocation19_spill]] %s3100_s22  ;;  %s45_s26 = sadd.s32 1, %s3100_s22 }
   0xe   : > { %p43_p0 = scmp.ge.s32.totalorder %s42_s25, 2  ;;  %s358_s27 = sadd.s32 1, %s3084_s19 }
   0xf   : > { %p368_p1 = scmp.ne.s32.totalorder %s3084_s19, %s3080_s18  ;;  %p369_p2 = scmp.eq.s32.totalorder %s2526_s23, 3 }
  0x10   : > { %s3741_s25 = smov (%p43_p0, %s42_s25), 0  ;;  %s3743_s26 = smov (!%p43_p0, %s45_s26), %s3100_s22 }
  0x11   : > { %3720 = sst [smem:[#allocation20_spill]] %s3741_s25  ;;  %s354_s28 = ssub.s32 %s3096_s12, %s3741_s25 }
  0x12   : > { %p3264_p3 = por %p369_p2, %p368_p1  ;;  %p47_p4 = scmp.ge.s32.totalorder %s3743_s26, 2 }
  0x13   : > { %p374_p5 = scmp.ne.s32.totalorder %s3080_s18, %s3076_s17  ;;  %p375_p6 = scmp.eq.s32.totalorder %s2527_s24, 3 }
  0x14   : > { %p2528_p7 = scmp.ge.s32.totalorder %s3104_s13, 1  ;;  %s3745_s26 = smov (%p47_p4, %s3743_s26), 0 }
  0x15   : > { %3722 = sst [smem:[#allocation21_spill]] %s3745_s26  ;;  %p3273_p8 = por %p375_p6, %p374_p5 }
  0x16   : > { %p382_p9 = scmp.lt.s32.totalorder %s3104_s13, 5  ;;  %s353_s15 = ssub.s32 %s3100_s22, %s3745_s26 }
  0x17   : > { %s3723_s30 = scalar_select %p3273_p8, 1, 0 }
  0x18   : > { %s355_s16 = sor.u32 %s354_s28, %s353_s15  ;;  %p3280_p10 = pnand %p2528_p7, %p382_p9 }
  0x19   : > { %3724 = sst [smem:[#allocation22_spill]] %s3723_s30  ;;  %p356_p11 = scmp.eq.s32.totalorder %s355_s16, 0 }
  0x1a   : > { %p3284_p12 = scmp.eq.s32.totalorder %s2526_s23, 0  ;;  %p2773_p13 = pneg %p3280_p10 }
  0x1b   : > { %s3291_s24 = scalar_select %p356_p11, %s3084_s19, %s358_s27  }
  0x1c   : > { %p3295_p0 = pnand %p3284_p12, %p2773_p13  ;;  %s3106_s28 = smov [#allocation9]  }
  0x1d   : > { %3727 = sst [smem:[#allocation23_spill]] %s3291_s24  ;;  %s416_s15 = sshll.u32 %s3106_s28, 4  ;;  %s417_s15 = int_to_ptr.vmem [resolvable:$true] %s416_s15 }
  0x1e   : > { %p2928_p1 = pneg %p3295_p0  ;;  %s2937_s23 = scalar_lea.vmem %s417_s15, 256 }
  0x1f   : > { %p2938_p2 = scmp.ne.s32.totalorder %s417_s15, %s2937_s23  ;;  %p2945_p6 = scmp.lt.s32.totalorder %s417_s15, %s417_s15 }
  0x20   : > { %p2946_p7 = scmp.lt.s32.totalorder %s2937_s23, %s2937_s23 }
  0x21   : > { %p2940_p4 = pnand %p2938_p2, %p2928_p1 }
  0x22   : > { %p2947_p9 = por %p2946_p7, %p2945_p6 }
  0x23   : > { %p2941_p5 = pneg %p2940_p4 }
  0x25   : > { %p2948_p11 = pnand %p2947_p9, %p2941_p5 }
  0x27   : > { %2951 = shalt.err (!%p2948_p11)
}
  0x28   : > { %s3107_s27 = smov 64   ;;  %s3108_s16 = smov 4  }
  0x29   : > { %2779 = dma.hbm_to_vmem [thread:$0]  (!%p3295_p0), %s3700_s6, 256, %s417_s15, [#allocation10], %s3107_s27, %s3107_s27, %s3108_s16  }
  0x2a   : > { %s3109_s22 = smov [#allocation6]   ;;  %s3110_s19 = smov [#allocation11]  }
  0x2b   : > { %s400_s24 = sshll.u32 %s3109_s22, 4  ;;  %s432_s17 = sshll.u32 %s3110_s19, 4  ;;  %s401_s24 = int_to_ptr.vmem [resolvable:$true] %s400_s24  ;;  %s433_s17 = int_to_ptr.vmem [resolvable:$true] %s432_s17 }
  0x2c   : > { %s2963_s23 = scalar_lea.vmem %s401_s24, 256  ;;  %p2971_p5 = scmp.lt.s32.totalorder %s401_s24, %s401_s24 }
  0x2d   : > { %p2964_p13 = scmp.ne.s32.totalorder %s401_s24, %s2963_s23  ;;  %p2972_p6 = scmp.lt.s32.totalorder %s2963_s23, %s2963_s23 }
  0x2f   : > { %p2966_p2 = pnand %p2964_p13, %p2928_p1  ;;  %p2973_p7 = por %p2972_p6, %p2971_p5 }
  0x31   : > { %p2967_p4 = pneg %p2966_p2 }
  0x33   : > { %p2974_p9 = pnand %p2973_p7, %p2967_p4 }
  0x35   : > { %2977 = shalt.err (!%p2974_p9)
}
  0x36   : > { %2776 = dma.hbm_to_vmem [thread:$0]  (!%p3295_p0), %s3698_s4, 256, %s401_s24, [#allocation7], %s3107_s27, %s3107_s27, %s3108_s16  }
  0x37   : > { %s2989_s26 = scalar_lea.vmem %s433_s17, 256  ;;  %p2997_p8 = scmp.lt.s32.totalorder %s433_s17, %s433_s17 }
  0x38   : > { %p2990_p11 = scmp.ne.s32.totalorder %s433_s17, %s2989_s26  ;;  %p2998_p5 = scmp.lt.s32.totalorder %s2989_s26, %s2989_s26 }
  0x3a   : > { %p2992_p13 = pnand %p2990_p11, %p2928_p1  ;;  %p2999_p4 = por %p2998_p5, %p2997_p8 }
  0x3c   : > { %p2993_p2 = pneg %p2992_p13 }
  0x3e   : > { %p3000_p6 = pnand %p2999_p4, %p2993_p2 }
  0x40   : > { %3003 = shalt.err (!%p3000_p6)
}
  0x41   : > { %2782 = dma.hbm_to_vmem [thread:$0]  (!%p3295_p0), %s3702_s8, 256, %s433_s17, [#allocation10], %s3107_s27, %s3107_s27, %s3108_s16  }
  0x42   : > { %477 = sbr.rel (%p3280_p10) target bundleno = 2881 (0xb41), region = 76 }
  0x47   : > { %3063 = dma.done.wait (%p3284_p12), [#allocation7], 256  }
  0x48   : > { %3065 = vsyncadd (%p3284_p12), [#allocation7], 4294967040 }
  0x49   : > { %3067 = dma.done.wait (%p3284_p12), [#allocation10], 512  }
  0x4a   : > { %3069 = vsyncadd (%p3284_p12), [#allocation10], 4294966784  ;;  %s531_s17 = sand.u32 1, %s3080_s18   ;;  %p534_p8 = scmp.lt.s32.totalorder %s3092_s21, 1  ;;  %v543_v2 = vld [vmem:[#allocation4] sm:$0x1] }
  0x4b   : > { %s3348_s25 = sshll.u32 %s531_s17, 3  ;;  %2755 = vpush %v543_v2  ;;  %p2540_p10 = scmp.ne.s32.totalorder %s3088_s20, 0 }
  0x4c   : > { %s3351_s30 = scalar_select %p534_p8, %s3092_s21, 1 }
  0x4d   : > { %s533_s15 = scalar_lea.vmem [#allocation12], %s3348_s25  ;;  %s3113_s27 = smov (!%p2540_p10), 112  }
  0x4e   : > { %s2613_s24 = sshll.u32 %s3351_s30, 4  ;;  %s541_s12 = scalar_lea.vmem %s3695_s1, %s3351_s30 }
  0x4f   : > { %s3361_s19 = scalar_lea.vmem %s3694_s0, %s2613_s24  ;;  %s3114_s16 = smov (!%p2540_p10), 120  }
  0x50   : > { %s3115_s23 = smov (!%p2540_p10), 104   ;;  %s3116_s22 = smov (!%p2540_p10), 96  }
  0x78   : > { %548 = sbr.rel (%p2540_p10) target bundleno = 757 (0x2f5), region = 92 }
  0x7c   : > { %s3363_s26 = spop %2755 }
  0x7d   : > { %v549_v3 = vld [vmem:[%s3361_s19] sm:$0xff]  ;;  %vm553_vm0 = vcmask 261120   ;;  %v550_v4 = vld [vmem:[%s3361_s19 + $0x8] sm:$0xff]  ;;  %v3111_v10 = vmov 0.0   ;;  %vm3112_vm1 = vmmov 0   ;;  %v564_v17 = vstv %s3363_s26 }
  0x7e   : > { %v551_v5 = vmul.f32 %v549_v3, %v549_v3  ;;  %v552_v6 = vmul.f32 %v550_v4, %v550_v4  ;;  %v2882_v9 = vld [vmem:[#allocation6 + $0x8] sm:$0xff]   ;;  %2663 = vmatprep.subr.bf16.mxu0 %v3111_v10  ;;  %2667 = vmatprep.mubr.msk.bf16.mxu0 %vm3112_vm1, %v3111_v10  ;;  %v2883_v11 = vld [vmem:[#allocation6] sm:$0xff]   ;;  %v2541_v24 = vld [vmem:[%s3699_s5] ss:$0 sm:$0xff]  ;;  %v3117_v31 = vmov 1983009808   ;;  %v662_v33 = vlaneseq }
  0x7f   : > { %2664 = vmatpush3.bf16.msra.mxu0 %v2882_v9  ;;  %v660_v32 = vunpack.c.l.s4 %v3117_v31  ;;  %v3118_v34 = vmov 1934713408   ;;  %vm961_vm2 = vcmask 60416  }
  0x80   : > { %v554_v7 = vsel %vm553_vm0, %v551_v5, 0.0  ;;  %v557_v8 = vsel %vm553_vm0, %v552_v6, 0.0  ;;  %2665 = vmatprep.subr.bf16.mxu0 %v3111_v10  ;;  %v692_v35 = vunpack.c.l.s4 %v3118_v34  ;;  %v663_v37 = vshrl.u32 %v662_v33, 7 }
  0x81   : > { %555 = vadd.xlane.f32.xlu0 %v554_v7  ;;  %v661_v36 = vunpack.c.0.s8 %v660_v32 }
  0x82   : > { %v693_v40 = vunpack.c.0.s8 %v692_v35 }
  0x83   : > { %2666 = vmatpush3.bf16.msra.mxu0 %v2883_v11  ;;  %v3385_v41 = vsub.s32 %v661_v36, %v663_v37 }
  0x84   : > { %v3388_v47 = vsub.s32 %v693_v40, %v663_v37 }
  0x85   : > { %558 = vadd.xlane.f32.xlu0 %v557_v8 }
 0x10a   : > { %v556_v12 = vpop.xlane.xlu0 %555 }
 0x10b   : > { %v560_v13 = vmax.f32 %v556_v12, 1e-10 }
 0x10d   : > { %2884 = vrsqrt.f32 %v560_v13 }
 0x10e   : > { %v559_v14 = vpop.xlane.xlu0 %558 }
 0x10f   : > { %v561_v15 = vmax.f32 %v559_v14, 1e-10 }
 0x111   : > { %2886 = vrsqrt.f32 %v561_v15 }
 0x11a   : > { %v2885_v16 = vpop.eup %2884 }
 0x11b   : > { %v565_v18 = vmul.f32 %v2885_v16, %v564_v17 }
 0x11d   : > { %v567_v21 = vmul.f32 %v565_v18, %v549_v3 }
 0x11e   : > { %v2887_v19 = vpop.eup %2886 }
 0x11f   : > { %v566_v20 = vmul.f32 %v2887_v19, %v564_v17 }
 0x121   : > { %v568_v22 = vmul.f32 %v566_v20, %v550_v4 }
 0x123   : > { %v569_v23 = vpack.c.bf16 %v568_v22, %v567_v21 }
 0x125   : > { %2668 = vmatmul.mubr.msk.bf16.vlgmr.msra.gmra.mxu0 %vm553_vm0, %v569_v23 }
 0x1e5   : > { %v630_v25 = vpop.f32.mrf.mxu0 }
 0x1e6   : > { %v631_v26 = vadd.f32 %v2541_v24, %v630_v25 }
 0x1e7   : > { %v2669_v27 = vpop.f32.mrf.mxu0 }
 0x1e8   : > { %645 = vrot.lane.b32.xlu0 %v631_v26, %s3113_s27  ;;  %639 = vrot.lane.b32.xlu1 %v631_v26, %s3114_s16 }
 0x1e9   : > { %v633_v28 = vpop.f32.mrf.mxu0 }
 0x1ea   : > { %v3376_v30 = vadd.f32 %v2541_v24, %v633_v28 }
 0x1eb   : > { %v2670_v29 = vpop.f32.mrf.mxu0 }
 0x1ec   : > { %651 = vrot.lane.b32.xlu1 %v631_v26, %s3115_s23 }
 0x1f0   : > { %641 = vrot.lane.b32.xlu1 %v3376_v30, %s3114_s16 }
 0x1f4   : > { %647 = vrot.lane.b32.xlu1 %v3376_v30, %s3113_s27 }
 0x1f8   : > { %653 = vrot.lane.b32.xlu1 %v3376_v30, %s3115_s23 }
 0x1fc   : > { %970 = vrot.lane.b32.xlu1 %v631_v26, %s3116_s22 }
 0x200   : > { %972 = vrot.lane.b32.xlu1 %v3376_v30, %s3116_s22 }
 0x25a   : > { %v646_v38 = vpop.permute.xlu0 %645  ;;  %v640_v39 = vpop.permute.xlu1 %639 }
 0x25b   : > { %974 = vrot.lane.b32.xlu1 %v640_v39, %s3116_s22  ;;  %v657_v42 = vcombine.low %v631_v26, %v646_v38  ;;  %v658_v43 = vcombine.high %v631_v26, %v646_v38 }
 0x25d   : > { %v665_v48 = vrot.slane %v657_v42, %v3385_v41  ;;  %v672_v49 = vrot.slane %v658_v43, %v3385_v41 }
 0x25e   : > { %v652_v44 = vpop.permute.xlu1 %651 }
 0x25f   : > { %v673_v45 = vcombine.low %v640_v39, %v652_v44  ;;  %v674_v46 = vcombine.high %v640_v39, %v652_v44  ;;  %978 = vrot.lane.b32.xlu1 %v646_v38, %s3116_s22 }
 0x261   : > { %v681_v50 = vrot.slane %v673_v45, %v3385_v41  ;;  %v688_v51 = vrot.slane %v674_v46, %v3385_v41 }
 0x262   : > { %v642_v52 = vpop.permute.xlu1 %641 }
 0x263   : > { %v689_v53 = vcombine.low %v665_v48, %v681_v50  ;;  %v690_v54 = vcombine.high %v665_v48, %v681_v50  ;;  %v705_v55 = vcombine.low %v672_v49, %v688_v51  ;;  %v706_v56 = vcombine.high %v672_v49, %v688_v51  ;;  %982 = vrot.lane.b32.xlu1 %v652_v44, %s3116_s22 }
 0x264   : > { %976 = vrot.lane.b32.xlu0 %v642_v52, %s3116_s22 }
 0x265   : > { %v697_v57 = vrot.slane %v689_v53, %v3388_v47  ;;  %v704_v58 = vrot.slane %v690_v54, %v3388_v47  ;;  %v713_v59 = vrot.slane %v705_v55, %v3388_v47  ;;  %v720_v60 = vrot.slane %v706_v56, %v3388_v47 }
 0x266   : > { %v648_v61 = vpop.permute.xlu1 %647 }
 0x267   : > { %v793_v62 = vcombine.low %v697_v57, %v704_v58  ;;  %v2545_v63 = vcombine.high %v697_v57, %v704_v58  ;;  %v809_v0 = vcombine.low %v713_v59, %v720_v60  ;;  %v2546_v1 = vcombine.high %v713_v59, %v720_v60 }
 0x268   : > { %980 = vrot.lane.b32.xlu0 %v648_v61, %s3116_s22  ;;  %v725_v6 = vcombine.low %v3376_v30, %v648_v61  ;;  %v726_v7 = vcombine.high %v3376_v30, %v648_v61 }
 0x269   : > { %v800_v2 = vrot.slane %v793_v62, %v3385_v41  ;;  %v808_v3 = vrot.slane %v2545_v63, %v3385_v41  ;;  %v816_v4 = vrot.slane %v809_v0, %v3385_v41  ;;  %v824_v5 = vrot.slane %v2546_v1, %v3385_v41 }
 0x26a   : > { %v654_v8 = vpop.permute.xlu1 %653  ;;  %v733_v19 = vrot.slane %v725_v6, %v3385_v41  ;;  %v740_v20 = vrot.slane %v726_v7, %v3385_v41 }
 0x26b   : > { %v825_v9 = vcombine.low %v800_v2, %v808_v3  ;;  %v826_v10 = vcombine.high %v800_v2, %v808_v3  ;;  %v841_v11 = vcombine.low %v816_v4, %v824_v5  ;;  %v842_v12 = vcombine.high %v816_v4, %v824_v5 }
 0x26c   : > { %v741_v13 = vcombine.low %v642_v52, %v654_v8  ;;  %v742_v14 = vcombine.high %v642_v52, %v654_v8  ;;  %984 = vrot.lane.b32.xlu0 %v654_v8, %s3116_s22 }
 0x26d   : > { %v833_v15 = vrot.slane %v825_v9, %v3388_v47  ;;  %v840_v16 = vrot.slane %v826_v10, %v3388_v47  ;;  %v849_v17 = vrot.slane %v841_v11, %v3388_v47  ;;  %v856_v18 = vrot.slane %v842_v12, %v3388_v47 }
 0x26e   : > { %v749_v21 = vrot.slane %v741_v13, %v3385_v41  ;;  %v756_v22 = vrot.slane %v742_v14, %v3385_v41  ;;  %v971_v1 = vpop.permute.xlu1 %970 }
 0x26f   : > { %v857_v23 = vcombine.low %v833_v15, %v849_v17  ;;  %v858_v24 = vcombine.high %v833_v15, %v849_v17  ;;  %v859_v25 = vcombine.low %v840_v16, %v856_v18  ;;  %v860_v26 = vcombine.high %v840_v16, %v856_v18 }
 0x270   : > { %v757_v27 = vcombine.low %v733_v19, %v749_v21  ;;  %v758_v28 = vcombine.high %v733_v19, %v749_v21  ;;  %v773_v29 = vcombine.low %v740_v20, %v756_v22  ;;  %v774_v30 = vcombine.high %v740_v20, %v756_v22 }
 0x271   : > { %v2614_v31 = vpack.c.bf16 %v857_v23, %v857_v23  ;;  %v2616_v32 = vpack.c.bf16 %v858_v24, %v858_v24  ;;  %v2618_v33 = vpack.c.bf16 %v859_v25, %v859_v25  ;;  %v2620_v34 = vpack.c.bf16 %v860_v26, %v860_v26 }
 0x272   : > { %v765_v35 = vrot.slane %v757_v27, %v3388_v47  ;;  %v772_v36 = vrot.slane %v758_v28, %v3388_v47  ;;  %v781_v37 = vrot.slane %v773_v29, %v3388_v47  ;;  %v788_v38 = vrot.slane %v774_v30, %v3388_v47  ;;  %v973_v2 = vpop.permute.xlu1 %972 }
 0x273   : > { %962 = vst.msk [vmem:[#allocation2] sm:$0xf] %vm961_vm2, %v2614_v31  ;;  %964 = vst.msk [vmem:[#allocation2 + $0x8] sm:$0xf] %vm961_vm2, %v2616_v32 }
 0x274   : > { %966 = vst.msk [vmem:[#allocation2 + $0x10] sm:$0xf] %vm961_vm2, %v2618_v33  ;;  %968 = vst.msk [vmem:[#allocation2 + $0x18] sm:$0xf] %vm961_vm2, %v2620_v34  ;;  %v861_v39 = vcombine.low %v765_v35, %v772_v36  ;;  %v2547_v40 = vcombine.high %v765_v35, %v772_v36  ;;  %v877_v42 = vcombine.low %v781_v37, %v788_v38 }
 0x275   : > { %v2548_v43 = vcombine.high %v781_v37, %v788_v38 }
 0x276   : > { %v868_v44 = vrot.slane %v861_v39, %v3385_v41  ;;  %v876_v45 = vrot.slane %v2547_v40, %v3385_v41  ;;  %v884_v46 = vrot.slane %v877_v42, %v3385_v41 }
 0x277   : > { %v892_v48 = vrot.slane %v2548_v43, %v3385_v41 }
 0x278   : > { %v893_v49 = vcombine.low %v868_v44, %v876_v45  ;;  %v894_v50 = vcombine.high %v868_v44, %v876_v45 }
 0x279   : > { %v909_v51 = vcombine.low %v884_v46, %v892_v48  ;;  %v910_v52 = vcombine.high %v884_v46, %v892_v48 }
 0x27a   : > { %v901_v53 = vrot.slane %v893_v49, %v3388_v47  ;;  %v908_v54 = vrot.slane %v894_v50, %v3388_v47 }
 0x27b   : > { %v917_v55 = vrot.slane %v909_v51, %v3388_v47  ;;  %v924_v56 = vrot.slane %v910_v52, %v3388_v47 }
 0x27d   : > { %v925_v57 = vcombine.low %v901_v53, %v917_v55  ;;  %v926_v58 = vcombine.high %v901_v53, %v917_v55  ;;  %v927_v59 = vcombine.low %v908_v54, %v924_v56  ;;  %v928_v60 = vcombine.high %v908_v54, %v924_v56 }
 0x27f   : > { %v2615_v61 = vpack.c.bf16 %v925_v57, %v925_v57  ;;  %v2617_v62 = vpack.c.bf16 %v926_v58, %v926_v58  ;;  %v2619_v63 = vpack.c.bf16 %v927_v59, %v927_v59  ;;  %v2621_v0 = vpack.c.bf16 %v928_v60, %v928_v60 }
 0x281   : > { %963 = vst.msk [vmem:[#allocation2 + $0x4] sm:$0xf] %vm961_vm2, %v2615_v61  ;;  %965 = vst.msk [vmem:[#allocation2 + $0xc] sm:$0xf] %vm961_vm2, %v2617_v62 }
 0x282   : > { %967 = vst.msk [vmem:[#allocation2 + $0x14] sm:$0xf] %vm961_vm2, %v2619_v63  ;;  %969 = vst.msk [vmem:[#allocation2 + $0x1c] sm:$0xf] %vm961_vm2, %v2621_v0 }
 0x2cd   : > { %v975_v3 = vpop.permute.xlu1 %974 }
 0x2d1   : > { %v979_v4 = vpop.permute.xlu1 %978 }
 0x2d2   : > { %v994_v5 = vcombine.low %v971_v1, %v979_v4  ;;  %v995_v6 = vcombine.high %v971_v1, %v979_v4 }
 0x2d4   : > { %v1002_v11 = vrot.slane %v994_v5, %v3385_v41  ;;  %v1009_v12 = vrot.slane %v995_v6, %v3385_v41 }
 0x2d5   : > { %v983_v7 = vpop.permute.xlu1 %982 }
 0x2d6   : > { %v977_v8 = vpop.permute.xlu0 %976  ;;  %v1010_v9 = vcombine.low %v975_v3, %v983_v7  ;;  %v1011_v10 = vcombine.high %v975_v3, %v983_v7 }
 0x2d8   : > { %v1018_v13 = vrot.slane %v1010_v9, %v3385_v41  ;;  %v1025_v14 = vrot.slane %v1011_v10, %v3385_v41 }
 0x2da   : > { %v1026_v15 = vcombine.low %v1002_v11, %v1018_v13  ;;  %v1027_v16 = vcombine.high %v1002_v11, %v1018_v13  ;;  %v1042_v17 = vcombine.low %v1009_v12, %v1025_v14  ;;  %v1043_v18 = vcombine.high %v1009_v12, %v1025_v14  ;;  %v981_v19 = vpop.permute.xlu0 %980 }
 0x2db   : > { %v1062_v24 = vcombine.low %v973_v2, %v981_v19  ;;  %v1063_v25 = vcombine.high %v973_v2, %v981_v19 }
 0x2dc   : > { %v1034_v20 = vrot.slane %v1026_v15, %v3388_v47  ;;  %v1041_v21 = vrot.slane %v1027_v16, %v3388_v47  ;;  %v1050_v22 = vrot.slane %v1042_v17, %v3388_v47  ;;  %v1057_v23 = vrot.slane %v1043_v18, %v3388_v47 }
 0x2dd   : > { %v1070_v37 = vrot.slane %v1062_v24, %v3385_v41  ;;  %v1077_v38 = vrot.slane %v1063_v25, %v3385_v41 }
 0x2de   : > { %v1130_v26 = vcombine.low %v1034_v20, %v1041_v21  ;;  %v2557_v27 = vcombine.high %v1034_v20, %v1041_v21  ;;  %v1146_v28 = vcombine.low %v1050_v22, %v1057_v23  ;;  %v2558_v29 = vcombine.high %v1050_v22, %v1057_v23  ;;  %v985_v30 = vpop.permute.xlu0 %984 }
 0x2df   : > { %v1078_v31 = vcombine.low %v977_v8, %v985_v30  ;;  %v1079_v32 = vcombine.high %v977_v8, %v985_v30 }
 0x2e0   : > { %v1137_v33 = vrot.slane %v1130_v26, %v3385_v41  ;;  %v1145_v34 = vrot.slane %v2557_v27, %v3385_v41  ;;  %v1153_v35 = vrot.slane %v1146_v28, %v3385_v41  ;;  %v1161_v36 = vrot.slane %v2558_v29, %v3385_v41 }
 0x2e1   : > { %v1086_v39 = vrot.slane %v1078_v31, %v3385_v41  ;;  %v1093_v40 = vrot.slane %v1079_v32, %v3385_v41 }
 0x2e2   : > { %v1162_v42 = vcombine.low %v1137_v33, %v1145_v34  ;;  %v1163_v43 = vcombine.high %v1137_v33, %v1145_v34  ;;  %v1178_v44 = vcombine.low %v1153_v35, %v1161_v36  ;;  %v1179_v45 = vcombine.high %v1153_v35, %v1161_v36 }
 0x2e3   : > { %v1094_v46 = vcombine.low %v1070_v37, %v1086_v39  ;;  %v1095_v48 = vcombine.high %v1070_v37, %v1086_v39  ;;  %v1110_v49 = vcombine.low %v1077_v38, %v1093_v40  ;;  %v1111_v50 = vcombine.high %v1077_v38, %v1093_v40 }
 0x2e4   : > { %v1170_v51 = vrot.slane %v1162_v42, %v3388_v47  ;;  %v1177_v52 = vrot.slane %v1163_v43, %v3388_v47  ;;  %v1186_v53 = vrot.slane %v1178_v44, %v3388_v47  ;;  %v1193_v54 = vrot.slane %v1179_v45, %v3388_v47 }
 0x2e5   : > { %v1102_v55 = vrot.slane %v1094_v46, %v3388_v47  ;;  %v1109_v56 = vrot.slane %v1095_v48, %v3388_v47  ;;  %v1118_v57 = vrot.slane %v1110_v49, %v3388_v47  ;;  %v1125_v58 = vrot.slane %v1111_v50, %v3388_v47 }
 0x2e6   : > { %v1194_v59 = vcombine.low %v1170_v51, %v1186_v53  ;;  %v1195_v60 = vcombine.high %v1170_v51, %v1186_v53  ;;  %v1196_v61 = vcombine.low %v1177_v52, %v1193_v54  ;;  %v1197_v62 = vcombine.high %v1177_v52, %v1193_v54 }
 0x2e7   : > { %v1198_v63 = vcombine.low %v1102_v55, %v1109_v56  ;;  %v2559_v0 = vcombine.high %v1102_v55, %v1109_v56  ;;  %v1214_v1 = vcombine.low %v1118_v57, %v1125_v58  ;;  %v2560_v2 = vcombine.high %v1118_v57, %v1125_v58 }
 0x2e8   : > { %v2622_v3 = vpack.c.bf16 %v1194_v59, %v1194_v59  ;;  %v2624_v4 = vpack.c.bf16 %v1195_v60, %v1195_v60  ;;  %v2626_v5 = vpack.c.bf16 %v1196_v61, %v1196_v61  ;;  %v2628_v6 = vpack.c.bf16 %v1197_v62, %v1197_v62 }
 0x2e9   : > { %v1205_v7 = vrot.slane %v1198_v63, %v3385_v41  ;;  %v1213_v8 = vrot.slane %v2559_v0, %v3385_v41  ;;  %v1221_v9 = vrot.slane %v1214_v1, %v3385_v41  ;;  %v1229_v10 = vrot.slane %v2560_v2, %v3385_v41 }
 0x2ea   : > { %1298 = vst.msk [vmem:[#allocation3] sm:$0xf] %vm961_vm2, %v2622_v3  ;;  %1300 = vst.msk [vmem:[#allocation3 + $0x8] sm:$0xf] %vm961_vm2, %v2624_v4 }
 0x2eb   : > { %1302 = vst.msk [vmem:[#allocation3 + $0x10] sm:$0xf] %vm961_vm2, %v2626_v5  ;;  %1304 = vst.msk [vmem:[#allocation3 + $0x18] sm:$0xf] %vm961_vm2, %v2628_v6  ;;  %v1230_v11 = vcombine.low %v1205_v7, %v1213_v8  ;;  %v1231_v12 = vcombine.high %v1205_v7, %v1213_v8  ;;  %v1246_v13 = vcombine.low %v1221_v9, %v1229_v10 }
 0x2ec   : > { %v1247_v14 = vcombine.high %v1221_v9, %v1229_v10 }
 0x2ed   : > { %v1238_v15 = vrot.slane %v1230_v11, %v3388_v47  ;;  %v1245_v16 = vrot.slane %v1231_v12, %v3388_v47  ;;  %v1254_v17 = vrot.slane %v1246_v13, %v3388_v47 }
 0x2ee   : > { %v1261_v41 = vrot.slane %v1247_v14, %v3388_v47 }
 0x2ef   : > { %v1262_v18 = vcombine.low %v1238_v15, %v1254_v17  ;;  %v1263_v19 = vcombine.high %v1238_v15, %v1254_v17 }
 0x2f0   : > { %v1264_v20 = vcombine.low %v1245_v16, %v1261_v41  ;;  %v1265_v21 = vcombine.high %v1245_v16, %v1261_v41 }
 0x2f1   : > { %v2623_v22 = vpack.c.bf16 %v1262_v18, %v1262_v18  ;;  %v2625_v23 = vpack.c.bf16 %v1263_v19, %v1263_v19 }
 0x2f2   : > { %v2627_v24 = vpack.c.bf16 %v1264_v20, %v1264_v20  ;;  %v2629_v25 = vpack.c.bf16 %v1265_v21, %v1265_v21 }
 0x2f3   : > { %1299 = vst.msk [vmem:[#allocation3 + $0x4] sm:$0xf] %vm961_vm2, %v2623_v22  ;;  %1301 = vst.msk [vmem:[#allocation3 + $0xc] sm:$0xf] %vm961_vm2, %v2625_v23 }
 0x2f4   : > { %1303 = vst.msk [vmem:[#allocation3 + $0x14] sm:$0xf] %vm961_vm2, %v2627_v24  ;;  %1305 = vst.msk [vmem:[#allocation3 + $0x1c] sm:$0xf] %vm961_vm2, %v2629_v25 }
 0x2f5 PF: > { %s2569_s28 = sshll.u32 %s3088_s20, 3  ;;  %vm1310_vm3 = vcmask 261120   ;;  %v2888_v28 = vld [vmem:[%s3696_s2 + $0x8] sm:$0xff]   ;;  %v3119_v29 = vmov 0.0   ;;  %vm3120_vm4 = vmmov 0   ;;  %v2889_v30 = vld [vmem:[%s3696_s2] sm:$0xff]   ;;  %v1316_v33 = vstv %s3363_s26 }
 0x2f6   : > { %s1307_s24 = scalar_lea.vmem %s3361_s19, %s2569_s28  ;;  %2671 = vmatprep.subr.bf16.mxu0 %v3119_v29  ;;  %2675 = vmatprep.mubr.msk.bf16.mxu0 %vm3120_vm4, %v3119_v29  ;;  %v2570_v38 = vld [vmem:[%s3697_s3] ss:$0 sm:$0xff]  ;;  %s3122_s26 = smov 120   ;;  %v2891_v45 = vld [vmem:[#allocation2 + $0x8] sm:$0xff]   ;;  %vm1558_vm5 = vcmask 64512   ;;  %v1401_v52 = vlaneseq  ;;  %v2892_v24 = vld [vmem:[#allocation2 + $0x10] sm:$0xff]  }
 0x2f7   : > { %v3478_v47 = vld [vmem:[%s1307_s24] sm:$0xff]  ;;  %2672 = vmatpush3.bf16.msra.mxu0 %v2888_v28  ;;  %2679 = vmatprep.subr.bf16.mxu1 %v3119_v29  ;;  %s3121_s24 = smov 112   ;;  %v1614_v49 = vsel %vm1558_vm5, %v2891_v45, 0  ;;  %s3123_s27 = smov 104   ;;  %v3124_v50 = vmov 1983009808  }
 0x2f8   : > { %v1309_v26 = vmul.f32 %v3478_v47, %v3478_v47  ;;  %2673 = vmatprep.subr.bf16.mxu0 %v3119_v29  ;;  %2681 = vmatprep.mubr.msk.bf16.mxu1 %vm3120_vm4, %v3119_v29  ;;  %v2890_v44 = vld [vmem:[#allocation2] sm:$0xff]   ;;  %v1399_v51 = vunpack.c.l.s4 %v3124_v50  ;;  %v3125_v53 = vmov 1934713408   ;;  %v3509_v56 = vshrl.u32 %v1401_v52, 7  ;;  %v2893_v25 = vld [vmem:[#allocation2 + $0x18] sm:$0xff]   ;;  %s3127_s30 = smov 16  }
 0x2f9   : > { %v1563_v48 = vsel %vm1558_vm5, %v2890_v44, 0  ;;  %v1431_v54 = vunpack.c.l.s4 %v3125_v53  ;;  %v1544_v44 = vld [vmem:[%s541_s12] sm:$0x1]  ;;  %vm1758_vm7 = vcmask 130048   ;;  %s3128_s12 = smov 8   ;;  %s3129_s23 = smov 24  }
 0x2fa   : > { %v1311_v27 = vsel %vm1310_vm3, %v1309_v26, 0.0  ;;  %2680 = vmatpush3.bf16.xpose.msra.mxu1 %v1563_v48  ;;  %v1400_v55 = vunpack.c.0.s8 %v1399_v51  ;;  %vm1545_vm6 = vcmp.gt.f32.partialorder %v1544_v44, 0.0  ;;  %v1550_v45 = vsub.s32 0, %v3509_v56 }
 0x2fb   : > { %1312 = vadd.xlane.f32.xlu0 %v1311_v27  ;;  %2674 = vmatpush3.bf16.msra.mxu0 %v2889_v30  ;;  %v1432_v58 = vunpack.c.0.s8 %v1431_v54  ;;  %vm2161_vm8 = vcmask 195584   ;;  %vm2350_vm9 = vcmask 523264  }
 0x2fc   : > { %2685 = vmatprep.subr.bf16.mxu0 %v3119_v29  ;;  %2691 = vmatprep.subr.bf16.mxu1 %v3119_v29  ;;  %v3512_v59 = vsub.s32 %v1400_v55, %v3509_v56 }
 0x2fd   : > { %v3515_v2 = vsub.s32 %v1432_v58, %v3509_v56 }
 0x384   : > { %v1313_v31 = vpop.xlane.xlu0 %1312 }
 0x385   : > { %v1314_v32 = vmax.f32 %v1313_v31, 1e-10 }
 0x387   : > { %2906 = vrsqrt.f32 %v1314_v32 }
 0x394   : > { %v2907_v34 = vpop.eup %2906 }
 0x395   : > { %v1317_v35 = vmul.f32 %v2907_v34, %v1316_v33  ;;  %v1665_v33 = vsel %vm1558_vm5, %v2892_v24, 0  ;;  %v1716_v34 = vsel %vm1558_vm5, %v2893_v25, 0 }
 0x397   : > { %v1318_v36 = vmul.f32 %v1317_v35, %v3478_v47 }
 0x399   : > { %v1319_v37 = vpack.c.bf16 %v1318_v36, %v1318_v36 }
 0x39b   : > { %2676 = vmatmul.mubr.msk.bf16.vlgmr.msra.gmra.mxu0 %vm1310_vm3, %v1319_v37 }
 0x39c   : > { %2687 = vmatprep.mubr.msk.bf16.mxu0 %vm3120_vm4, %v3119_v29  ;;  %2686 = vmatpush3.bf16.xpose.msra.mxu0 %v1614_v49 }
 0x39d   : > { %2697 = vmatprep.subr.bf16.mxu0 %v3119_v29 }
 0x45b   : > { %v1380_v39 = vpop.f32.mrf.mxu0 }
 0x45c   : > { %v1381_v40 = vadd.f32 %v2570_v38, %v1380_v39 }
 0x45d   : > { %v2677_v42 = vpop.f32.mrf.mxu0 }
 0x45e   : > { %1390 = vrot.lane.b32.xlu1 %v1381_v40, %s3121_s24  ;;  %1387 = vrot.lane.b32.xlu0 %v1381_v40, %s3122_s26  ;;  %s2609_s26 = sshll.u32 %s3092_s21, 1  ;;  %s3130_s24 = smov [#allocation12]  }
 0x45f   : > { %v1383_v43 = vpop.f32.mrf.mxu0 }
 0x461   : > { %v2678_v46 = vpop.f32.mrf.mxu0 }
 0x462   : > { %1393 = vrot.lane.b32.xlu1 %v1381_v40, %s3123_s27  ;;  %v3126_v46 = vmov -1e+09   ;;  %s2408_s27 = sadd.s32 %s3088_s20, %s2609_s26  ;;  %s2397_s20 = scalar_lea.sflag [#allocation8], %s531_s17 }
 0x463   : > { %v1546_v48 = vsel %vm1545_vm6, 0.0, %v3126_v46  ;;  %s3008_s26 = sshll.u32 %s3130_s24, 4  ;;  %s3009_s26 = int_to_ptr.vmem [resolvable:$false] %s3008_s26 }
 0x464   : > { %v1551_v49 = vrot.slane %v1546_v48, %v1550_v45  ;;  %v2897_v45 = vld [vmem:[#allocation3 + $0x18] sm:$0xff]  }
 0x4d0   : > { %v1391_v57 = vpop.permute.xlu1 %1390  ;;  %v1388_v62 = vpop.permute.xlu0 %1387 }
 0x4d1   : > { %v1396_v60 = vcombine.low %v1381_v40, %v1391_v57  ;;  %v1397_v61 = vcombine.high %v1381_v40, %v1391_v57 }
 0x4d3   : > { %v1404_v3 = vrot.slane %v1396_v60, %v3512_v59  ;;  %v1411_v4 = vrot.slane %v1397_v61, %v3512_v59 }
 0x4d4   : > { %v1394_v63 = vpop.permute.xlu1 %1393 }
 0x4d5   : > { %v1412_v0 = vcombine.low %v1388_v62, %v1394_v63  ;;  %v1413_v1 = vcombine.high %v1388_v62, %v1394_v63 }
 0x4d7   : > { %v1420_v5 = vrot.slane %v1412_v0, %v3512_v59  ;;  %v1427_v6 = vrot.slane %v1413_v1, %v3512_v59 }
 0x4d9   : > { %v1428_v7 = vcombine.low %v1404_v3, %v1420_v5  ;;  %v1429_v8 = vcombine.high %v1404_v3, %v1420_v5  ;;  %v1444_v9 = vcombine.low %v1411_v4, %v1427_v6  ;;  %v1445_v10 = vcombine.high %v1411_v4, %v1427_v6 }
 0x4db   : > { %v1436_v11 = vrot.slane %v1428_v7, %v3515_v2  ;;  %v1443_v12 = vrot.slane %v1429_v8, %v3515_v2  ;;  %v1452_v13 = vrot.slane %v1444_v9, %v3515_v2  ;;  %v1459_v14 = vrot.slane %v1445_v10, %v3515_v2 }
 0x4dd   : > { %v1464_v15 = vcombine.low %v1436_v11, %v1443_v12  ;;  %v2574_v16 = vcombine.high %v1436_v11, %v1443_v12  ;;  %v1480_v17 = vcombine.low %v1452_v13, %v1459_v14  ;;  %v2575_v41 = vcombine.high %v1452_v13, %v1459_v14 }
 0x4df   : > { %v1471_v18 = vrot.slane %v1464_v15, %v3512_v59  ;;  %v1479_v19 = vrot.slane %v2574_v16, %v3512_v59  ;;  %v1487_v20 = vrot.slane %v1480_v17, %v3512_v59  ;;  %v1495_v21 = vrot.slane %v2575_v41, %v3512_v59 }
 0x4e1   : > { %v1496_v22 = vcombine.low %v1471_v18, %v1479_v19  ;;  %v1512_v23 = vcombine.low %v1487_v20, %v1495_v21  ;;  %v1497_v26 = vcombine.high %v1471_v18, %v1479_v19  ;;  %v1513_v27 = vcombine.high %v1487_v20, %v1495_v21 }
 0x4e3   : > { %v1504_v28 = vrot.slane %v1496_v22, %v3515_v2  ;;  %v1520_v30 = vrot.slane %v1512_v23, %v3515_v2  ;;  %v1511_v37 = vrot.slane %v1497_v26, %v3515_v2  ;;  %v1527_v38 = vrot.slane %v1513_v27, %v3515_v2 }
 0x4e5   : > { %v1528_v31 = vcombine.low %v1504_v28, %v1520_v30  ;;  %v1529_v32 = vcombine.high %v1504_v28, %v1520_v30  ;;  %v1530_v39 = vcombine.low %v1511_v37, %v1527_v38  ;;  %v1531_v40 = vcombine.high %v1511_v37, %v1527_v38 }
 0x4e7   : > { %v1532_v35 = vpack.c.bf16 %v1528_v31, %v1528_v31  ;;  %v1533_v36 = vpack.c.bf16 %v1529_v32, %v1529_v32  ;;  %v1534_v42 = vpack.c.bf16 %v1530_v39, %v1530_v39  ;;  %v1535_v43 = vpack.c.bf16 %v1531_v40, %v1531_v40  ;;  %v2894_v32 = vld [vmem:[#allocation3] sm:$0xff]   ;;  %v2896_v40 = vld [vmem:[#allocation3 + $0x10] sm:$0xff]  }
 0x4e9   : > { %2682 = vmatmul.mubr.msk.bf16.vlgmr.msra.gmra.mxu1 %vm1558_vm5, %v1532_v35  ;;  %2688 = vmatmul.mubr.msk.bf16.vlgmr.msra.gmra.mxu0 %vm1558_vm5, %v1533_v36 }
 0x4ea   : > { %2692 = vmatpush3.bf16.xpose.msra.mxu1 %v1665_v33  ;;  %2698 = vmatpush3.bf16.xpose.msra.mxu0 %v1716_v34  ;;  %v2895_v33 = vld [vmem:[#allocation3 + $0x8] sm:$0xff]  }
 0x4eb   : > { %2693 = vmatprep.mubr.msk.bf16.mxu1 %vm3120_vm4, %v3119_v29  ;;  %2699 = vmatprep.mubr.msk.bf16.mxu0 %vm3120_vm4, %v3119_v29 }
 0x4ec   : > { %2703 = vmatprep.subr.bf16.mxu1 %v3119_v29  ;;  %2709 = vmatprep.subr.bf16.mxu0 %v3119_v29 }
 0x4f1   : > { %2694 = vmatmul.mubr.msk.bf16.vlgmr.msra.gmra.mxu1 %vm1558_vm5, %v1534_v42  ;;  %2700 = vmatmul.mubr.msk.bf16.vlgmr.msra.gmra.mxu0 %vm1558_vm5, %v1535_v43 }
 0x4f2   : > { %2705 = vmatprep.mubr.msk.bf16.mxu1 %vm3120_vm4, %v3119_v29  ;;  %2711 = vmatprep.mubr.msk.bf16.mxu0 %vm3120_vm4, %v3119_v29 }
 0x4f3   : > { %2704 = vmatpush3.bf16.msra.mxu1 %v2894_v32  ;;  %2710 = vmatpush3.bf16.msra.mxu0 %v2895_v33 }
 0x4f4   : > { %2715 = vmatprep.subr.bf16.mxu1 %v3119_v29  ;;  %2721 = vmatprep.subr.bf16.mxu0 %v3119_v29 }
 0x5a9   : > { %v1599_v50 = vpop.f32.mrf.mxu1  ;;  %v1650_v51 = vpop.f32.mrf.mxu0 }
 0x5aa   : > { %v1600_v52 = vadd.f32 %v1599_v50, %v1551_v49  ;;  %v1651_v53 = vadd.f32 %v1650_v51, %v1551_v49 }
 0x5ab   : > { %v2683_v54 = vpop.f32.mrf.mxu1  ;;  %v2689_v55 = vpop.f32.mrf.mxu0 }
 0x5ac   : > { %v1759_v57 = vsel %vm1758_vm7, %v1600_v52, -inf  ;;  %v1762_v58 = vsel %vm1758_vm7, %v1651_v53, -inf  ;;  %v2898_v54 = vld [vmem:[#allocation9 + $0x8] sm:$0xff]  }
 0x5ad   : > { %1760 = vmax.xlane.f32.xlu1 %v1759_v57  ;;  %v1602_v60 = vpop.f32.mrf.mxu1  ;;  %1763 = vmax.xlane.f32.xlu0 %v1762_v58  ;;  %v1653_v61 = vpop.f32.mrf.mxu0 }
 0x5af   : > { %v2684_v62 = vpop.f32.mrf.mxu1  ;;  %v2690_v56 = vpop.f32.mrf.mxu0 }
 0x5b1   : > { %v1701_v63 = vpop.f32.mrf.mxu1  ;;  %v1752_v0 = vpop.f32.mrf.mxu0 }
 0x5b2   : > { %v1702_v1 = vadd.f32 %v1701_v63, %v1551_v49  ;;  %v1753_v5 = vadd.f32 %v1752_v0, %v1551_v49 }
 0x5b3   : > { %v2695_v3 = vpop.f32.mrf.mxu1  ;;  %v2701_v4 = vpop.f32.mrf.mxu0 }
 0x5b4   : > { %v1765_v6 = vsel %vm1758_vm7, %v1702_v1, -inf  ;;  %v1768_v11 = vsel %vm1758_vm7, %v1753_v5, -inf }
 0x5b5   : > { %1766 = vmax.xlane.f32.xlu1 %v1765_v6  ;;  %v1704_v7 = vpop.f32.mrf.mxu1  ;;  %v1755_v8 = vpop.f32.mrf.mxu0 }
 0x5b7   : > { %v2696_v9 = vpop.f32.mrf.mxu1  ;;  %v2702_v10 = vpop.f32.mrf.mxu0 }
 0x5b9   : > { %1769 = vmax.xlane.f32.xlu1 %v1768_v11 }
 0x636   : > { %v1761_v12 = vpop.xlane.xlu1 %1760  ;;  %v1764_v13 = vpop.xlane.xlu0 %1763 }
 0x637   : > { %v1771_v14 = vsub.f32 %v1600_v52, %v1761_v12  ;;  %v1772_v15 = vsub.f32 %v1651_v53, %v1764_v13 }
 0x639   : > { %v1775_v16 = vmul.f32 1.442695, %v1771_v14  ;;  %v1777_v17 = vmul.f32 1.442695, %v1772_v15 }
 0x63b   : > { %2908 = vpow2.f32 %v1775_v16 }
 0x63c   : > { %2910 = vpow2.f32 %v1777_v17 }
 0x63e   : > { %v1767_v41 = vpop.xlane.xlu1 %1766 }
 0x63f   : > { %v1773_v18 = vsub.f32 %v1702_v1, %v1767_v41 }
 0x641   : > { %v1779_v19 = vmul.f32 1.442695, %v1773_v18 }
 0x642   : > { %v1770_v20 = vpop.xlane.xlu1 %1769 }
 0x643   : > { %2912 = vpow2.f32 %v1779_v19  ;;  %v1774_v21 = vsub.f32 %v1753_v5, %v1770_v20  ;;  %v2899_v20 = vld [vmem:[#allocation9] sm:$0xff]  }
 0x645   : > { %v1781_v22 = vmul.f32 1.442695, %v1774_v21 }
 0x647   : > { %2914 = vpow2.f32 %v1781_v22 }
 0x648   : > { %v2909_v23 = vpop.eup %2908 }
 0x649   : > { %v1783_v24 = vsel %vm1758_vm7, %v2909_v23, 0.0  ;;  %v2911_v25 = vpop.eup %2910 }
 0x64a   : > { %1784 = vadd.xlane.f32.xlu1 %v1783_v24  ;;  %v1786_v26 = vsel %vm1758_vm7, %v2911_v25, 0.0 }
 0x64e   : > { %1787 = vadd.xlane.f32.xlu1 %v1786_v26 }
 0x650   : > { %v2913_v27 = vpop.eup %2912 }
 0x651   : > { %v1789_v28 = vsel %vm1758_vm7, %v2913_v27, 0.0 }
 0x652   : > { %1790 = vadd.xlane.f32.xlu0 %v1789_v28 }
 0x654   : > { %v2915_v30 = vpop.eup %2914 }
 0x655   : > { %v1792_v31 = vsel %vm1758_vm7, %v2915_v30, 0.0 }
 0x656   : > { %1793 = vadd.xlane.f32.xlu1 %v1792_v31 }
 0x6d3   : > { %v1785_v34 = vpop.xlane.xlu1 %1784 }
 0x6d4   : > { %2916 = vrcp.f32 %v1785_v34 }
 0x6d7   : > { %v1788_v35 = vpop.xlane.xlu1 %1787 }
 0x6d8   : > { %2918 = vrcp.f32 %v1788_v35 }
 0x6db   : > { %v1791_v36 = vpop.xlane.xlu0 %1790 }
 0x6dc   : > { %2920 = vrcp.f32 %v1791_v36 }
 0x6df   : > { %v1794_v37 = vpop.xlane.xlu1 %1793 }
 0x6e0   : > { %2922 = vrcp.f32 %v1794_v37 }
 0x6e1   : > { %v2917_v38 = vpop.eup %2916 }
 0x6e2   : > { %v1799_v39 = vmul.f32 %v2917_v38, %v2909_v23 }
 0x6e4   : > { %v1803_v42 = vpack.c.bf16 %v1799_v39, %v1799_v39 }
 0x6e5   : > { %v2919_v43 = vpop.eup %2918 }
 0x6e6   : > { %2706 = vmatmul.mubr.msk.bf16.vlgmr.msra.gmra.mxu1 %vm1758_vm7, %v1803_v42  ;;  %v1800_v44 = vmul.f32 %v2919_v43, %v2911_v25 }
 0x6e7   : > { %2716 = vmatpush3.bf16.msra.mxu1 %v2896_v40  ;;  %2717 = vmatprep.mubr.msk.bf16.mxu1 %vm3120_vm4, %v3119_v29 }
 0x6e8   : > { %v1804_v46 = vpack.c.bf16 %v1800_v44, %v1800_v44  ;;  %2727 = vmatprep.subr.bf16.mxu1 %v3119_v29 }
 0x6e9   : > { %v2921_v48 = vpop.eup %2920 }
 0x6ea   : > { %2712 = vmatmul.mubr.msk.bf16.vlgmr.msra.gmra.mxu0 %vm1758_vm7, %v1804_v46  ;;  %v1801_v49 = vmul.f32 %v2921_v48, %v2913_v27 }
 0x6eb   : > { %2722 = vmatpush3.bf16.msra.mxu0 %v2897_v45  ;;  %2723 = vmatprep.mubr.msk.bf16.mxu0 %vm3120_vm4, %v3119_v29 }
 0x6ec   : > { %v1805_v50 = vpack.c.bf16 %v1801_v49, %v1801_v49  ;;  %2735 = vmatprep.subr.bf16.mxu0 %v3119_v29 }
 0x6ed   : > { %v2923_v51 = vpop.eup %2922 }
 0x6ee   : > { %2718 = vmatmul.mubr.msk.bf16.vlgmr.msra.gmra.mxu1 %vm1758_vm7, %v1805_v50  ;;  %v1802_v52 = vmul.f32 %v2923_v51, %v2915_v30 }
 0x6ef   : > { %2731 = vmatprep.mubr.msk.bf16.mxu1 %vm3120_vm4, %v3119_v29  ;;  %2728 = vmatpush3.bf16.msra.mxu1 %v2898_v54  ;;  %v2594_v54 = vld [vmem:[%s3701_s7] ss:$0 sm:$0xff] }
 0x6f0   : > { %v1806_v53 = vpack.c.bf16 %v1802_v52, %v1802_v52  ;;  %2729 = vmatprep.subr.bf16.mxu1 %v3119_v29 }
 0x6f2   : > { %2724 = vmatmul.mubr.msk.bf16.vlgmr.msra.gmra.mxu0 %vm1758_vm7, %v1806_v53  ;;  %v2231_v53 = vld [vmem:[#allocation5] sm:$0x1] }
 0x6f3   : > { %2739 = vmatprep.mubr.msk.bf16.mxu0 %vm3120_vm4, %v3119_v29  ;;  %2730 = vmatpush3.bf16.msra.mxu1 %v2899_v20  ;;  %2757 = vpush %v2231_v53 }
 0x6f4   : > { %2743 = vmatprep.subr.bf16.mxu1 %v3119_v29 }
 0x724   : > { %s2758_s19 = spop %2757 }
 0x7a6   : > { %v1858_v55 = vpop.f32.mrf.mxu1 }
 0x7a8   : > { %v2707_v57 = vpop.f32.mrf.mxu1 }
 0x7aa   : > { %v1861_v58 = vpop.f32.mrf.mxu1  ;;  %v1907_v60 = vpop.f32.mrf.mxu0 }
 0x7ac   : > { %v2708_v61 = vpop.f32.mrf.mxu1  ;;  %v2713_v62 = vpop.f32.mrf.mxu0 }
 0x7ae   : > { %v1910_v56 = vpop.f32.mrf.mxu0  ;;  %v1956_v63 = vpop.f32.mrf.mxu1 }
 0x7af   : > { %v2011_v3 = vcombine.low %v1858_v55, %v1956_v63  ;;  %v2012_v4 = vcombine.high %v1858_v55, %v1956_v63 }
 0x7b0   : > { %v2714_v0 = vpop.f32.mrf.mxu0  ;;  %v2719_v1 = vpop.f32.mrf.mxu1 }
 0x7b1   : > { %v2019_v11 = vrot.slane %v2011_v3, %v3512_v59  ;;  %v2026_v12 = vrot.slane %v2012_v4, %v3512_v59  ;;  %v2900_v0 = vld [vmem:[#allocation11 + $0x8] sm:$0xff]   ;;  %v2901_v1 = vld [vmem:[#allocation11] sm:$0xff]   ;;  %v2902_v3 = vld [vmem:[%s3704_s10 + $0x18] sm:$0xff]  }
 0x7b2   : > { %v1959_v5 = vpop.f32.mrf.mxu1  ;;  %v2005_v6 = vpop.f32.mrf.mxu0  ;;  %2736 = vmatpush3.bf16.msra.mxu0 %v2900_v0 }
 0x7b3   : > { %v2027_v7 = vcombine.low %v1907_v60, %v2005_v6  ;;  %v2028_v8 = vcombine.high %v1907_v60, %v2005_v6  ;;  %2737 = vmatprep.subr.bf16.mxu0 %v3119_v29  ;;  %v2239_v6 = vstv %s2758_s19 }
 0x7b4   : > { %v2720_v9 = vpop.f32.mrf.mxu1  ;;  %v2725_v10 = vpop.f32.mrf.mxu0 }
 0x7b5   : > { %v2035_v13 = vrot.slane %v2027_v7, %v3512_v59  ;;  %v2042_v14 = vrot.slane %v2028_v8, %v3512_v59 }
 0x7b6   : > { %v2008_v15 = vpop.f32.mrf.mxu0  ;;  %2738 = vmatpush3.bf16.msra.mxu0 %v2901_v1 }
 0x7b7   : > { %v2043_v16 = vcombine.low %v2019_v11, %v2035_v13  ;;  %v2044_v17 = vcombine.high %v2019_v11, %v2035_v13  ;;  %v2059_v41 = vcombine.low %v2026_v12, %v2042_v14  ;;  %v2060_v18 = vcombine.high %v2026_v12, %v2042_v14  ;;  %v2904_v11 = vld [vmem:[%s3704_s10 + $0x8] sm:$0xff]   ;;  %v2905_v12 = vld [vmem:[%s3704_s10] sm:$0xff]  }
 0x7b8   : > { %v2726_v19 = vpop.f32.mrf.mxu0  ;;  %v2598_v13 = vld [vmem:[%s3703_s9] ss:$0 sm:$0xff] }
 0x7b9   : > { %v2051_v21 = vrot.slane %v2043_v16, %v3515_v2  ;;  %v2058_v22 = vrot.slane %v2044_v17, %v3515_v2  ;;  %v2067_v23 = vrot.slane %v2059_v41, %v3515_v2  ;;  %v2074_v24 = vrot.slane %v2060_v18, %v3515_v2 }
 0x7bb   : > { %v2079_v25 = vcombine.low %v2051_v21, %v2058_v22  ;;  %v2592_v26 = vcombine.high %v2051_v21, %v2058_v22  ;;  %v2095_v27 = vcombine.low %v2067_v23, %v2074_v24  ;;  %v2593_v28 = vcombine.high %v2067_v23, %v2074_v24 }
 0x7bd   : > { %v2086_v30 = vrot.slane %v2079_v25, %v3512_v59  ;;  %v2094_v31 = vrot.slane %v2592_v26, %v3512_v59  ;;  %v2102_v32 = vrot.slane %v2095_v27, %v3512_v59  ;;  %v2110_v33 = vrot.slane %v2593_v28, %v3512_v59 }
 0x7bf   : > { %v2112_v34 = vcombine.high %v2086_v30, %v2094_v31  ;;  %v2128_v35 = vcombine.high %v2102_v32, %v2110_v33  ;;  %v2111_v36 = vcombine.low %v2086_v30, %v2094_v31  ;;  %v2127_v37 = vcombine.low %v2102_v32, %v2110_v33 }
 0x7c1   : > { %v2126_v38 = vrot.slane %v2112_v34, %v3515_v2  ;;  %v2142_v39 = vrot.slane %v2128_v35, %v3515_v2  ;;  %v2119_v40 = vrot.slane %v2111_v36, %v3515_v2  ;;  %v2135_v42 = vrot.slane %v2127_v37, %v3515_v2 }
 0x7c3   : > { %v2145_v43 = vcombine.low %v2126_v38, %v2142_v39  ;;  %v2144_v44 = vcombine.high %v2119_v40, %v2135_v42  ;;  %v2143_v45 = vcombine.low %v2119_v40, %v2135_v42  ;;  %v2146_v59 = vcombine.high %v2126_v38, %v2142_v39 }
 0x7c5   : > { %2152 = vrot.lane.b32.xlu1 %v2145_v43, %s3127_s30  ;;  %2148 = vrot.lane.b32.xlu0 %v2144_v44, %s3128_s12  ;;  %s2610_s30 = sshll.u32 %s2408_s27, 7  ;;  %s2412_s12 = sshll.u32 %s533_s15, 4  ;;  %s3639_s12 = int_to_ptr.vmem [resolvable:$true] %s2412_s12 }
 0x7c6   : > { %s3637_s28 = scalar_lea.hbm %s3707_s14, %s2610_s30  ;;  %s3004_s21 = scalar_lea.vmem %s3639_s12, 128 }
 0x7c7   : > { %p3005_p12 = scmp.ne.s32.totalorder %s3639_s12, %s3004_s21  ;;  %s3010_s27 = scalar_lea.vmem %s3009_s26, 256 }
 0x7c8   : > { %p3011_p7 = scmp.lt.s32.totalorder %s3639_s12, %s3009_s26  ;;  %p3012_p9 = scmp.lt.s32.totalorder %s3010_s27, %s3004_s21 }
 0x7c9   : > { %2156 = vrot.lane.b32.xlu1 %v2146_v59, %s3129_s23  ;;  %p3006_p0 = pnand %p3005_p12, %p3264_p3 }
 0x7ca   : > { %p3013_p11 = por %p3012_p9, %p3011_p7 }
 0x7cb   : > { %p3007_p1 = pneg %p3006_p0 }
 0x7cd   : > { %p3014_p13 = pnand %p3013_p11, %p3007_p1 }
 0x837   : > { %v2153_v46 = vpop.permute.xlu1 %2152  ;;  %v2149_v48 = vpop.permute.xlu0 %2148 }
 0x838   : > { %v2159_v49 = vsel %vm1558_vm5, %v2143_v45, %v2149_v48 }
 0x839   : > { %v2160_v51 = vsel %vm1758_vm7, %v2159_v49, %v2153_v46 }
 0x83b   : > { %v2157_v50 = vpop.permute.xlu1 %2156 }
 0x83c   : > { %v2162_v52 = vsel %vm2161_vm8, %v2160_v51, %v2157_v50 }
 0x83d   : > { %v2163_v2 = vpack.c.bf16 %v2162_v52, %v2162_v52 }
 0x83f   : > { %2732 = vmatmul.mubr.msk.bf16.vlgmr.msra.gmra.mxu1 %vm1310_vm3, %v2163_v2 }
 0x840   : > { %2751 = vmatprep.mubr.msk.bf16.mxu1 %vm3120_vm4, %v3119_v29  ;;  %2744 = vmatpush3.bf16.msra.mxu1 %v2902_v3 }
 0x841   : > { %2745 = vmatprep.subr.bf16.mxu1 %v3119_v29 }
 0x8ff   : > { %v2224_v55 = vpop.f32.mrf.mxu1 }
 0x900   : > { %v2225_v57 = vadd.f32 %v2594_v54, %v2224_v55 }
 0x901   : > { %v2733_v58 = vpop.f32.mrf.mxu1 }
 0x902   : > { %v2230_v60 = vadd.f32 %v2225_v57, %v3478_v47  ;;  %v2903_v47 = vld [vmem:[%s3704_s10 + $0x10] sm:$0xff]  }
 0x903   : > { %v2227_v61 = vpop.f32.mrf.mxu1  ;;  %2746 = vmatpush3.bf16.msra.mxu1 %v2903_v47 }
 0x904   : > { %v2233_v62 = vmul.f32 %v2230_v60, %v2230_v60  ;;  %2747 = vmatprep.subr.bf16.mxu1 %v3119_v29 }
 0x905   : > { %v2734_v56 = vpop.f32.mrf.mxu1 }
 0x906   : > { %v2234_v63 = vsel %vm1310_vm3, %v2233_v62, 0.0 }
 0x907   : > { %2235 = vadd.xlane.f32.xlu0 %v2234_v63  ;;  %2748 = vmatpush3.bf16.msra.mxu1 %v2904_v11 }
 0x908   : > { %2749 = vmatprep.subr.bf16.mxu1 %v3119_v29  ;;  %v2602_v29 = vld [vmem:[%s3705_s11] ss:$0 sm:$0xff] }
 0x90b   : > { %2750 = vmatpush3.bf16.msra.mxu1 %v2905_v12 }
 0x990   : > { %v2236_v4 = vpop.xlane.xlu0 %2235 }
 0x991   : > { %v2237_v5 = vmax.f32 %v2236_v4, 1e-10 }
 0x993   : > { %2924 = vrsqrt.f32 %v2237_v5 }
 0x9a0   : > { %v2925_v7 = vpop.eup %2924 }
 0x9a1   : > { %v2240_v8 = vmul.f32 %v2925_v7, %v2239_v6 }
 0x9a3   : > { %v2241_v9 = vmul.f32 %v2240_v8, %v2230_v60 }
 0x9a5   : > { %v2242_v10 = vpack.c.bf16 %v2241_v9, %v2241_v9 }
 0x9a7   : > { %2740 = vmatmul.mubr.msk.bf16.vlgmr.msra.gmra.mxu0 %vm1310_vm3, %v2242_v10 }
 0xa67   : > { %v2303_v14 = vpop.f32.mrf.mxu0 }
 0xa68   : > { %v2304_v15 = vadd.f32 %v2598_v13, %v2303_v14 }
 0xa69   : > { %v2741_v16 = vpop.f32.mrf.mxu0 }
 0xa6a   : > { %v2309_v17 = vmax.f32 %v2304_v15, 0.0 }
 0xa6b   : > { %v2306_v41 = vpop.f32.mrf.mxu0 }
 0xa6c   : > { %v2310_v18 = vpack.c.bf16 %v2309_v17, %v2309_v17 }
 0xa6d   : > { %v2742_v19 = vpop.f32.mrf.mxu0 }
 0xa6e   : > { %2752 = vmatmul.mubr.msk.bf16.vlgmr.msra.gmra.mxu1 %vm2350_vm9, %v2310_v18 }
 0xb2e   : > { %v2388_v20 = vpop.f32.mrf.mxu1 }
 0xb2f   : > { %v2389_v21 = vadd.f32 %v2602_v29, %v2388_v20 }
 0xb30   : > { %v2753_v22 = vpop.f32.mrf.mxu1 }
 0xb31   : > { %v2394_v23 = vadd.f32 %v2389_v21, %v2230_v60 }
 0xb32   : > { %v2391_v24 = vpop.f32.mrf.mxu1 }
 0xb33   : > { %2395 = vst.msk [vmem:[%s533_s15] sm:$0xff] %vm1310_vm3, %v2394_v23 }
 0xb34   : > { %v2754_v25 = vpop.f32.mrf.mxu1 }
 0xb35   : > { %3017 = shalt.err (!%p3014_p13)
}
 0xb36   : > { %s3018_s25 = scalar_lea.hbm %s3637_s28, 128  ;;  %s3022_s16 = scalar_lea.hbm %s3707_s14, 512 }
 0xb37   : > { %p3019_p2 = scmp.ne.s32.totalorder %s3637_s28, %s3018_s25  ;;  %p3023_p6 = scmp.lt.s32.totalorder %s3637_s28, %s3707_s14 }
 0xb38   : > { %p3024_p8 = scmp.lt.s32.totalorder %s3022_s16, %s3018_s25 }
 0xb39   : > { %p3020_p5 = pnand %p3019_p2, %p3264_p3 }
 0xb3a   : > { %p3025_p10 = por %p3024_p8, %p3023_p6 }
 0xb3b   : > { %p3021_p4 = pneg %p3020_p5 }
 0xb3d   : > { %p3026_p12 = pnand %p3025_p10, %p3021_p4 }
 0xb3f   : > { %3029 = shalt.err (!%p3026_p12)
}
 0xb40   : > { %2771 = dma.vmem_to_hbm [thread:$0]  (%p3264_p3), %s3639_s12, 128, %s3637_s28, %s2397_s20  }
 0xb41 PF: > { %s3729_s23 = sld [smem:[#allocation16_spill]]  ;;  %p2793_p0 = scmp.ge.s32.totalorder %s3104_s13, 2 }
 0xb42   : > { %s3730_s22 = sld [smem:[#allocation22_spill]] }
 0xb47   : > { %s2424_s21 = sand.u32 1, %s3729_s23  }
 0xb48   : > { %p3731_p1 = scmp.ne.s32.totalorder %s3730_s22, 0  ;;  %s2425_s24 = scalar_lea.sflag [#allocation8], %s2424_s21 }
 0xb4a   : > { %p2784_p7 = pnand %p2793_p0, %p3731_p1 }
 0xb4c   : > { %p2785_p9 = pneg %p2784_p7 }
 0xb4e   : > { %3071 = dma.done.wait (%p2785_p9), %s2425_s24, 128  }
 0xb4f   : > { %3073 = vsyncadd (%p2785_p9), %s2425_s24, 4294967168  ;;  %s33_s13 = sadd.s32 1, %s3104_s13   ;;  %s3732_s29 = sld [smem:[#allocation17_spill]] }
 0xb50   : > { %p30_p11 = scmp.ge.s32.totalorder %s33_s13, 6   ;;  %s3733_s19 = sld [smem:[#allocation23_spill]] }
 0xb51   : > { %s3734_s20 = sld [smem:[#allocation18_spill]]  ;;  %s3738_s17 = smov %s3080_s18 }
 0xb52   : > { %s3735_s21 = sld [smem:[#allocation19_spill]]  ;;  %32 = sbr.rel (!%p30_p11) target bundleno = 10 (0xa), region = 132 }
 0xb53   : > { %s3736_s12 = sld [smem:[#allocation20_spill]] }
 0xb54   : > { %s3737_s22 = sld [smem:[#allocation21_spill]] }
 0xb55   : > { %s3739_s18 = smov %s3732_s29 }
 0xb57   :  { %2430 = vsyncpa [#allocation7], 1 }
 0xb58   :  { %2432 = vsyncpa [#allocation7 + $0x1], 1 }
 0xb59   :  { %2433 = vsyncpa [#allocation10], 1 }
 0xb5a   :  { %2434 = vsyncpa [#allocation8], 1 }
 0xb5b   :  { %2436 = vsyncpa [#allocation8 + $0x1], 1 }

</bundles_post_ra>
